<compile_context>
chip_gen: v6e
topology: v6e:2x2x1
jax: 0.10.0
libtpu: 0.0.40
codegen_flags: <defaults>
</compile_context>

<pallas_src>
import jax
import jax.numpy as jnp
from jax.experimental import pallas as pl
from jax.experimental.pallas import tpu as pltpu


def _autoencoder_kernel(x_ref, we_ref, be_ref, wd_ref, bd_ref, o_ref):
    # x_ref:  (TB, D_in) f32 batch tile (auto-pipelined)
    # we_ref: (D_in, H)  bf16 encoder weight, pre-transposed (K, N), VMEM-resident
    # be_ref: (1, H)     f32 encoder bias
    # wd_ref: (H, D_in)  bf16 decoder weight, pre-transposed (K, N), VMEM-resident
    # bd_ref: (1, D_in)  f32 decoder bias
    # o_ref:  (TB, D_in) f32 output tile
    x = x_ref[...].astype(jnp.bfloat16)              # VPU cast; halves MXU operand width
    h = jnp.dot(x, we_ref[...],
                preferred_element_type=jnp.float32) + be_ref[...]   # f32 acc + f32 bias
    # Intentional precision tradeoff: h is downcast to bf16 for the second MXU pass.
    y = jnp.dot(h.astype(jnp.bfloat16), wd_ref[...],
                preferred_element_type=jnp.float32) + bd_ref[...]
    o_ref[...] = y.astype(o_ref.dtype)


def _round_up(v, m):
    return ((v + m - 1) // m) * m


def autoencoder_forward(x, enc_w, enc_b, dec_w, dec_b, *, batch_tile=1024):
    """x: (B, D_in); enc_w: (H, D_in); enc_b: (H,); dec_w: (D_in, H); dec_b: (D_in,)."""
    B, D_in = x.shape
    H, D_in_w = enc_w.shape
    assert D_in_w == D_in and dec_w.shape == (D_in, H)

    # One-time wrapper-side layout/dtype prep (tiny, amortized over the whole call):
    #   weights -> (K, N) layout + bf16, biases -> 2-D f32 rows.
    we_t = enc_w.T.astype(jnp.bfloat16)          # (D_in, H)
    wd_t = dec_w.T.astype(jnp.bfloat16)          # (H, D_in)
    be = enc_b.reshape(1, H).astype(jnp.float32)
    bd = dec_b.reshape(1, D_in).astype(jnp.float32)

    # --- batch-tile selection -------------------------------------------------
    if B <= 16:
        TB = B                                    # whole batch: always a legal block
    else:
        row_bytes = D_in * x.dtype.itemsize
        target_tile = 2 * 1024 * 1024             # ~2 MiB x-tiles -> near HBM roofline
        tb_cap = max(16, (target_tile // row_bytes) // 16 * 16)
        tb_steps = max(16, _round_up(pl.cdiv(B, 4), 16))   # aim for >= 4 grid steps
        TB = max(16, min(batch_tile, tb_cap, tb_steps, _round_up(B, 16)))
        TB = (TB // 16) * 16                      # multiple of 16 (bf16 sublane packing)
        steps = pl.cdiv(B, TB)
        if steps > 1 and steps % 2:               # even step count: balanced on v7x megacore
            TB = max(16, (_round_up(pl.cdiv(B, steps + 1), 16) // 16) * 16)
    grid = (pl.cdiv(B, TB),)

    # --- VMEM budget ------------------------------------------------------------
    x_itemsize = x.dtype.itemsize
    tile_bytes = TB * D_in * x_itemsize
    resident_bytes = 2 * H * D_in * 2 + (H + D_in) * 4      # bf16 weights + f32 biases
    need = 2 * 2 * tile_bytes + resident_bytes               # double-buffered x & out + params
    vmem_request = 2 * need                                  # headroom for Mosaic scratch
    try:
        vmem_cap = int(pltpu.get_tpu_info().vmem_capacity_bytes)
    except Exception:                                        # pragma: no cover
        vmem_cap = 64 * 1024 * 1024
    if vmem_cap >= 128 * 1024 * 1024:
        ceiling = 100 * 1024 * 1024       # v5e / v6e: 128 MiB physical
    else:
        ceiling = 48 * 1024 * 1024        # v7x: 64 MiB physical, 2 TCs share chip
    vmem_limit = int(max(4 * 1024 * 1024, min(vmem_request, ceiling)))

    flops = 2 * (2 * B * D_in * H)                            # two matmuls
    bytes_accessed = (2 * B * D_in) * x_itemsize + 2 * H * D_in * 2 + (H + D_in) * 4

    return pl.pallas_call(
        _autoencoder_kernel,
        out_shape=jax.ShapeDtypeStruct((B, D_in), x.dtype),
        grid=grid,
        in_specs=[
            pl.BlockSpec((TB, D_in), lambda i: (i, 0)),   # x: batch-tiled, pipelined
            pl.BlockSpec((D_in, H), lambda i: (0, 0)),    # enc_w (K,N): VMEM-resident
            pl.BlockSpec((1, H), lambda i: (0, 0)),       # enc_b
            pl.BlockSpec((H, D_in), lambda i: (0, 0)),    # dec_w (K,N): VMEM-resident
            pl.BlockSpec((1, D_in), lambda i: (0, 0)),    # dec_b
        ],
        out_specs=pl.BlockSpec((TB, D_in), lambda i: (i, 0)),
        compiler_params=pltpu.CompilerParams(
            dimension_semantics=("parallel",),
            vmem_limit_bytes=vmem_limit,
        ),
        cost_estimate=pl.CostEstimate(
            flops=flops, transcendentals=0, bytes_accessed=bytes_accessed),
    )(x, we_t, be, wd_t, bd)


def reference_forward_f32(x, enc_w, enc_b, dec_w, dec_b):
    h = x @ enc_w.T + enc_b
    return h @ dec_w.T + dec_b


def reference_forward_bf16(x, enc_w, enc_b, dec_w, dec_b):
    # Mirrors the kernel's precision policy: bf16 MXU operands, f32 accumulation/bias.
    h = jnp.dot(x.astype(jnp.bfloat16), enc_w.T.astype(jnp.bfloat16),
                preferred_element_type=jnp.float32) + enc_b
    y = jnp.dot(h.astype(jnp.bfloat16), dec_w.T.astype(jnp.bfloat16),
                preferred_element_type=jnp.float32) + dec_b
    return y


if __name__ == "__main__":
    # Lane-dense shapes (last dims multiples of 128); batch chosen so the grid
    # has 4 (even) steps with the default tile selection.
    batch, input_size, hidden_size = 2048, 256, 128

    key = jax.random.PRNGKey(0)
    kx, k1, k2, k3, k4 = jax.random.split(key, 5)

    x = jax.random.normal(kx, (batch, input_size), dtype=jnp.float32)

    # Deterministic parameter init (uniform, roughly PyTorch Linear style).
    bound_e = 1.0 / (input_size ** 0.5)
    bound_d = 1.0 / (hidden_size ** 0.5)
    enc_w = jax.random.uniform(k1, (hidden_size, input_size), jnp.float32,
                               -bound_e, bound_e)
    enc_b = jax.random.uniform(k2, (hidden_size,), jnp.float32, -bound_e, bound_e)
    dec_w = jax.random.uniform(k3, (input_size, hidden_size), jnp.float32,
                               -bound_d, bound_d)
    dec_b = jax.random.uniform(k4, (input_size,), jnp.float32, -bound_d, bound_d)

    y = autoencoder_forward(x, enc_w, enc_b, dec_w, dec_b)
    jax.block_until_ready(y)
    assert y.shape == (batch, input_size)

    # Tight check vs. the matching bf16-matmul / f32-accumulate reference path.
    y_bf16_ref = reference_forward_bf16(x, enc_w, enc_b, dec_w, dec_b)
    assert jnp.allclose(y, y_bf16_ref, atol=2e-3, rtol=2e-3), "mismatch vs bf16 reference"

    # Loose check vs. the full-f32 PyTorch-equivalent forward (precision tradeoff bound).
    y_f32_ref = reference_forward_f32(x, enc_w, enc_b, dec_w, dec_b)
    assert jnp.allclose(y, y_f32_ref, atol=5e-2, rtol=5e-2), "mismatch vs f32 reference"

    print("KERNEL_OK")
</pallas_src>

<mosaic_0001>
module attributes {stable_mosaic.version = 11 : i64} {
  func.func @_autoencoder_kernel(%arg0: i32, %arg1: memref<512x256xf32, #tpu.memory_space<vmem>>, %arg2: memref<256x128xbf16, #tpu.memory_space<vmem>>, %arg3: memref<1x128xf32, #tpu.memory_space<vmem>>, %arg4: memref<128x256xbf16, #tpu.memory_space<vmem>>, %arg5: memref<1x256xf32, #tpu.memory_space<vmem>>, %arg6: memref<512x256xf32, #tpu.memory_space<vmem>>) attributes {dimension_semantics = [#tpu.dimension_semantics<parallel>], iteration_bounds = array<i64: 4>, scalar_prefetch = 0 : i64, scratch_operands = 0 : i64, tpu.core_type = #tpu.core_type<tc>, window_params = [{transform_indices = @transform_0, window_bounds = array<i64: 512, 256>}, {pipeline_mode = #tpu.pipeline_mode<synchronous>, transform_indices = @transform_1, window_bounds = array<i64: 256, 128>}, {pipeline_mode = #tpu.pipeline_mode<synchronous>, transform_indices = @transform_2, window_bounds = array<i64: 1, 128>}, {pipeline_mode = #tpu.pipeline_mode<synchronous>, transform_indices = @transform_3, window_bounds = array<i64: 128, 256>}, {pipeline_mode = #tpu.pipeline_mode<synchronous>, transform_indices = @transform_4, window_bounds = array<i64: 1, 256>}, {transform_indices = @transform_5, window_bounds = array<i64: 512, 256>}]} {
    %c0 = arith.constant 0 : index
    %c0_0 = arith.constant 0 : index
    %0 = vector.load %arg1[%c0, %c0_0] : memref<512x256xf32, #tpu.memory_space<vmem>>, vector<512x256xf32>
    %1 = arith.truncf %0 : vector<512x256xf32> to vector<512x256xbf16>
    %c0_1 = arith.constant 0 : index
    %c0_2 = arith.constant 0 : index
    %2 = vector.load %arg2[%c0_1, %c0_2] : memref<256x128xbf16, #tpu.memory_space<vmem>>, vector<256x128xbf16>
    %cst = arith.constant dense<0.000000e+00> : vector<512x128xf32>
    %3 = tpu.matmul %1, %2, %cst {dimension_numbers = #tpu.dot_dimension_numbers<[1], [0], [0], [1], [0, 0, 1, 1], [], []>} : vector<512x256xbf16>, vector<256x128xbf16>, vector<512x128xf32> -> vector<512x128xf32>
    %c0_3 = arith.constant 0 : index
    %c0_4 = arith.constant 0 : index
    %4 = vector.load %arg3[%c0_3, %c0_4] : memref<1x128xf32, #tpu.memory_space<vmem>>, vector<1x128xf32>
    %5 = vector.broadcast %4 : vector<1x128xf32> to vector<512x128xf32>
    %6 = arith.addf %3, %5 : vector<512x128xf32>
    %7 = arith.truncf %6 : vector<512x128xf32> to vector<512x128xbf16>
    %c0_5 = arith.constant 0 : index
    %c0_6 = arith.constant 0 : index
    %8 = vector.load %arg4[%c0_5, %c0_6] : memref<128x256xbf16, #tpu.memory_space<vmem>>, vector<128x256xbf16>
    %cst_7 = arith.constant dense<0.000000e+00> : vector<512x256xf32>
    %9 = tpu.matmul %7, %8, %cst_7 {dimension_numbers = #tpu.dot_dimension_numbers<[1], [0], [0], [1], [0, 0, 1, 1], [], []>} : vector<512x128xbf16>, vector<128x256xbf16>, vector<512x256xf32> -> vector<512x256xf32>
    %c0_8 = arith.constant 0 : index
    %c0_9 = arith.constant 0 : index
    %10 = vector.load %arg5[%c0_8, %c0_9] : memref<1x256xf32, #tpu.memory_space<vmem>>, vector<1x256xf32>
    %11 = vector.broadcast %10 : vector<1x256xf32> to vector<512x256xf32>
    %12 = arith.addf %9, %11 : vector<512x256xf32>
    %c0_10 = arith.constant 0 : index
    %c0_11 = arith.constant 0 : index
    %13 = vector.load %arg6[%c0_10, %c0_11] : memref<512x256xf32, #tpu.memory_space<vmem>>, vector<512x256xf32>
    tpu.vector_store %arg6[%c0_10, %c0_11], %12 {strides = array<i32>} : memref<512x256xf32, #tpu.memory_space<vmem>>, vector<512x256xf32>,
    return
  }
  func.func @transform_0(%arg0: i32) -> (i32, i32) {
    %c0_i32 = arith.constant 0 : i32
    %c0_i32_0 = arith.constant 0 : i32
    return %arg0, %c0_i32 : i32, i32
  }
  func.func @transform_1(%arg0: i32) -> (i32, i32) {
    %c0_i32 = arith.constant 0 : i32
    %c0_i32_0 = arith.constant 0 : i32
    %c0_i32_1 = arith.constant 0 : i32
    return %c0_i32, %c0_i32_0 : i32, i32
  }
  func.func @transform_2(%arg0: i32) -> (i32, i32) {
    %c0_i32 = arith.constant 0 : i32
    %c0_i32_0 = arith.constant 0 : i32
    %c0_i32_1 = arith.constant 0 : i32
    return %c0_i32, %c0_i32_0 : i32, i32
  }
  func.func @transform_3(%arg0: i32) -> (i32, i32) {
    %c0_i32 = arith.constant 0 : i32
    %c0_i32_0 = arith.constant 0 : i32
    %c0_i32_1 = arith.constant 0 : i32
    return %c0_i32, %c0_i32_0 : i32, i32
  }
  func.func @transform_4(%arg0: i32) -> (i32, i32) {
    %c0_i32 = arith.constant 0 : i32
    %c0_i32_0 = arith.constant 0 : i32
    %c0_i32_1 = arith.constant 0 : i32
    return %c0_i32, %c0_i32_0 : i32, i32
  }
  func.func @transform_5(%arg0: i32) -> (i32, i32) {
    %c0_i32 = arith.constant 0 : i32
    %c0_i32_0 = arith.constant 0 : i32
    return %arg0, %c0_i32 : i32, i32
  }
}

</mosaic_0001>

<bundles_post_ra>
// kernel: tpu_custom_call.1
= control target key start
LH: loop header
LB: loop body
LE: loop exit
PB: predicated region body
PF: predicated region fallthrough
CT: control target
= control target key end

     0   :  { %10 = vsyncpa [#allocation3], 0  ;;  %s2829_s0 = inlined_call_operand.hbm [shape: f32[2048,256], index: 0, kind: input, shape index: {}]   ;;  %s2830_s1 = inlined_call_operand.hbm [shape: bf16[256,128], index: 1, kind: input, shape index: {}]   ;;  %s2831_s2 = inlined_call_operand.hbm [shape: f32[1,128], index: 2, kind: input, shape index: {}]   ;;  %s2832_s3 = inlined_call_operand.hbm [shape: bf16[128,256], index: 3, kind: input, shape index: {}]   ;;  %s2833_s4 = inlined_call_operand.hbm [shape: f32[1,256], index: 4, kind: input, shape index: {}]   ;;  %s2834_s5 = inlined_call_operand.hbm [shape: f32[2048,256], index: 5, kind: output, shape index: {}]  }
   0x1   :  { %12 = vsyncpa [#allocation3 + $0x1], 0 }
   0x2   :  { %13 = vsyncpa [#allocation6], 0 }
   0x3   :  { %14 = vsyncpa [#allocation9], 0 }
   0x4   :  { %15 = vsyncpa [#allocation4], 0 }
   0x5   :  { %17 = vsyncpa [#allocation4 + $0x1], 0  ;;  %s2112_s18 = smov 0   ;;  %s2114_s19 = smov 0  }
   0x6   :  { %s2116_s20 = smov 0   ;;  %s2118_s21 = smov 0  }
   0x7 LB: > { %s2133_s22 = sadd.s32 4294967295, %s2065_s21   ;;  %s1664_s23 = sadd.s32 4294967294, %s2065_s21   ;;  %s2065_s21 = sphi %s2118_s21, %s2857_s21   ;;  %s2061_s20 = sphi %s2116_s20, %s2856_s20   ;;  %s2057_s19 = sphi %s2114_s19, %s2855_s19   ;;  %s2053_s18 = sphi %s2112_s18, %s2854_s18  }
   0x8   : > { %p43_p0 = scmp.ne.s32.totalorder %s2057_s19, %s2053_s18  ;;  %p2835_p1 = scmp.eq.s32.totalorder %s2133_s22, 0 }
   0x9   : > { %p157_p3 = scmp.eq.s32.totalorder %s1664_s23, 3  ;;  %p1665_p5 = scmp.ge.s32.totalorder %s2065_s21, 1 }
   0xa   : > { %p2142_p4 = por %p2835_p1, %p43_p0  ;;  %p164_p7 = scmp.lt.s32.totalorder %s2065_s21, 5 }
   0xb   : > { %p2147_p6 = por %p157_p3, %p43_p0  ;;  %s2067_s27 = smov [#allocation5]  }
   0xc   : > { %s2839_s24 = scalar_select %p2142_p4, 1, 0 }
   0xd   : > { %s2840_s25 = scalar_select %p2147_p6, 1, 0 }
   0xe   : > { %p2152_p8 = pnand %p1665_p5, %p164_p7  ;;  %s176_s28 = sshll.u32 %s2067_s27, 4  ;;  %s177_s28 = int_to_ptr.vmem [resolvable:$true] %s176_s28 }
   0xf   : > { %s2068_s30 = smov [#allocation8]   ;;  %s1872_s7 = scalar_lea.vmem %s177_s28, 2048 }
  0x10   : > { %s2841_s26 = scalar_select %p2152_p8, 1, 0 }
  0x11   : > { %p1745_p9 = pneg %p2152_p8  ;;  %s200_s6 = sshll.u32 %s2068_s30, 4  ;;  %s201_s6 = int_to_ptr.vmem [resolvable:$true] %s200_s6 }
  0x12   : > { %p1873_p12 = scmp.ne.s32.totalorder %s177_s28, %s1872_s7  ;;  %p1880_p3 = scmp.lt.s32.totalorder %s177_s28, %s177_s28 }
  0x13   : > { %p2160_p10 = pnand %p1745_p9, %p2835_p1  ;;  %p1881_p5 = scmp.lt.s32.totalorder %s1872_s7, %s1872_s7 }
  0x15   : > { %p1863_p11 = pneg %p2160_p10  ;;  %p1882_p7 = por %p1881_p5, %p1880_p3 }
  0x17   : > { %p1875_p13 = pnand %p1873_p12, %p1863_p11 }
  0x19   : > { %p1876_p0 = pneg %p1875_p13 }
  0x1b   : > { %p1883_p9 = pnand %p1882_p7, %p1876_p0 }
  0x1d   : > { %1886 = shalt.err (!%p1883_p9)
}
  0x1e   : > { %s2069_s8 = smov 64   ;;  %s2070_s9 = smov 4  }
  0x1f   : > { %1748 = dma.hbm_to_vmem [thread:$0]  (!%p2160_p10), %s2830_s1, 2048, %s177_s28, [#allocation6], %s2069_s8, %s2069_s8, %s2070_s9  }
  0x20   : > { %s1898_s12 = scalar_lea.vmem %s201_s6, 2048  ;;  %p1906_p2 = scmp.lt.s32.totalorder %s201_s6, %s201_s6 }
  0x21   : > { %p1899_p1 = scmp.ne.s32.totalorder %s201_s6, %s1898_s12  ;;  %p1907_p6 = scmp.lt.s32.totalorder %s1898_s12, %s1898_s12 }
  0x23   : > { %p1901_p12 = pnand %p1899_p1, %p1863_p11  ;;  %p1908_p3 = por %p1907_p6, %p1906_p2 }
  0x25   : > { %p1902_p13 = pneg %p1901_p12 }
  0x27   : > { %p1909_p0 = pnand %p1908_p3, %p1902_p13 }
  0x29   : > { %1912 = shalt.err (!%p1909_p0)
}
  0x2a   : > { %s2071_s13 = smov 128   ;;  %s2072_s14 = smov 8  }
  0x2b   : > { %1754 = dma.hbm_to_vmem [thread:$0]  (!%p2160_p10), %s2832_s3, 2048, %s201_s6, [#allocation9], %s2071_s13, %s2071_s13, %s2072_s14  }
  0x2c   : > { %s2073_s17 = smov [#allocation7]   ;;  %s2074_s27 = smov [#allocation10]  }
  0x2d   : > { %s190_s23 = sshll.u32 %s2073_s17, 4  ;;  %s214_s28 = sshll.u32 %s2074_s27, 4  ;;  %s191_s23 = int_to_ptr.vmem [resolvable:$true] %s190_s23  ;;  %s215_s28 = int_to_ptr.vmem [resolvable:$true] %s214_s28 }
  0x2e   : > { %s1924_s30 = scalar_lea.vmem %s191_s23, 16  ;;  %s1931_s7 = scalar_lea.vmem %s191_s23, 32 }
  0x2f   : > { %p1925_p1 = scmp.ne.s32.totalorder %s191_s23, %s1924_s30  ;;  %p1932_p5 = scmp.lt.s32.totalorder %s191_s23, %s191_s23 }
  0x30   : > { %p1933_p7 = scmp.lt.s32.totalorder %s1931_s7, %s1924_s30 }
  0x31   : > { %p1927_p2 = pnand %p1925_p1, %p1863_p11 }
  0x32   : > { %p1934_p9 = por %p1933_p7, %p1932_p5 }
  0x33   : > { %p1928_p6 = pneg %p1927_p2 }
  0x35   : > { %p1935_p12 = pnand %p1934_p9, %p1928_p6 }
  0x37   : > { %1938 = shalt.err (!%p1935_p12)
}
  0x38   : > { %1751 = dma.hbm_to_vmem [thread:$0]  (!%p2160_p10), %s2831_s2, 16, %s191_s23, [#allocation6]  }
  0x39   : > { %s1950_s9 = scalar_lea.vmem %s215_s28, 32  ;;  %p1958_p1 = scmp.lt.s32.totalorder %s215_s28, %s215_s28 }
  0x3a   : > { %p1951_p13 = scmp.ne.s32.totalorder %s215_s28, %s1950_s9  ;;  %p1959_p2 = scmp.lt.s32.totalorder %s1950_s9, %s1950_s9 }
  0x3c   : > { %p1953_p3 = pnand %p1951_p13, %p1863_p11  ;;  %p1960_p4 = por %p1959_p2, %p1958_p1 }
  0x3e   : > { %p1954_p0 = pneg %p1953_p3 }
  0x40   : > { %p1961_p8 = pnand %p1960_p4, %p1954_p0 }
  0x42   : > { %1964 = shalt.err (!%p1961_p8)
}
  0x43   : > { %1757 = dma.hbm_to_vmem [thread:$0]  (!%p2160_p10), %s2833_s4, 32, %s215_s28, [#allocation9]  }
  0x44   : > { %s2199_s12 = sadd.s32 1, %s2065_s21   ;;  %s30_s29 = sadd.s32 1, %s2061_s20 }
  0x45   : > { %s27_s13 = ssub.s32 %s2065_s21, %s2199_s12  ;;  %p37_p8 = scmp.ne.s32.totalorder %s2061_s20, %s2057_s19 }
  0x46   : > { %p28_p4 = scmp.eq.s32.totalorder %s27_s13, 0  ;;  %p38_p11 = scmp.eq.s32.totalorder %s2065_s21, 0 }
  0x47   : > { %p2843_p5 = scmp.eq.s32.totalorder %s2133_s22, 3  ;;  %p1770_p9 = scmp.lt.s32.totalorder %s2065_s21, 4 }
  0x48   : > { %s2208_s14 = scalar_select %p28_p4, %s2061_s20, %s30_s29  }
  0x49   : > { %p39_p6 = por %p38_p11, %p37_p8  ;;  %p2212_p7 = por %p2843_p5, %p37_p8 }
  0x4a   : > { %s225_s16 = sand.u32 1, %s2061_s20   ;;  %s1722_s23 = sshll.u32 %s2065_s21, 14 }
  0x4b   : > { %s2844_s15 = scalar_select %p2212_p7, 1, 0 }
  0x4c   : > { %s1671_s17 = sshll.u32 %s225_s16, 10  ;;  %s2222_s30 = scalar_lea.hbm %s2829_s0, %s1722_s23 }
  0x4d   : > { %s229_s7 = scalar_lea.vmem [#allocation2], %s1671_s17  ;;  %p2226_p10 = pnand %p1770_p9, %p39_p6 }
  0x4e   : > { %s237_s6 = sshll.u32 %s229_s7, 4  ;;  %s2230_s9 = scalar_lea.sflag [#allocation3], %s225_s16  ;;  %s2224_s6 = int_to_ptr.vmem [resolvable:$true] %s237_s6 }
  0x4f   : > { %s1965_s10 = scalar_lea.hbm %s2222_s30, 16384  ;;  %p1967_p13 = pneg %p2226_p10 }
  0x50   : > { %p1966_p12 = scmp.ne.s32.totalorder %s2222_s30, %s1965_s10  ;;  %s1970_s29 = scalar_lea.hbm %s2829_s0, 65536 }
  0x51   : > { %p1971_p1 = scmp.lt.s32.totalorder %s2222_s30, %s2829_s0  ;;  %p1972_p2 = scmp.lt.s32.totalorder %s1970_s29, %s1965_s10 }
  0x52   : > { %p1968_p3 = pnand %p1967_p13, %p1966_p12 }
  0x53   : > { %p1973_p4 = por %p1972_p2, %p1971_p1 }
  0x54   : > { %p1969_p0 = pneg %p1968_p3 }
  0x56   : > { %p1974_p8 = pnand %p1973_p4, %p1969_p0 }
  0x58   : > { %1977 = shalt.err (!%p1974_p8)
}
  0x59   : > { %s1978_s16 = scalar_lea.vmem %s2224_s6, 16384  ;;  %s2075_s27 = smov [#allocation2]  }
  0x5a   : > { %p1979_p11 = scmp.ne.s32.totalorder %s2224_s6, %s1978_s16  ;;  %s1983_s28 = sshll.u32 %s2075_s27, 4  ;;  %s1984_s28 = int_to_ptr.vmem [resolvable:$false] %s1983_s28 }
  0x5b   : > { %s1985_s7 = scalar_lea.vmem %s1984_s28, 32768  ;;  %p1986_p9 = scmp.lt.s32.totalorder %s2224_s6, %s1984_s28 }
  0x5c   : > { %p1981_p6 = pnand %p1979_p11, %p1967_p13  ;;  %p1987_p12 = scmp.lt.s32.totalorder %s1985_s7, %s1978_s16 }
  0x5e   : > { %p1982_p5 = pneg %p1981_p6  ;;  %p1988_p3 = por %p1987_p12, %p1986_p9 }
  0x60   : > { %p1989_p7 = pnand %p1988_p3, %p1982_p5 }
  0x62   : > { %1992 = shalt.err (!%p1989_p7)
}
  0x63   : > { %s2076_s10 = smov 256   ;;  %s2077_s11 = smov 16  }
  0x64   : > { %1761 = dma.hbm_to_vmem [thread:$0]  (!%p2226_p10), %s2222_s30, 16384, %s2224_s6, %s2230_s9, %s2076_s10, %s2076_s10, %s2077_s11  }
  0x65   : > { %p2846_p13 = scmp.ne.s32.totalorder %s2841_s26, 0 }
  0x66   : > { %s2254_s13 = sand.u32 (!%p2846_p13), 1, %s2057_s19   ;;  %p2847_p7 = scmp.ne.s32.totalorder (!%p2846_p13), %s2839_s24, 0 }
  0x67   : > { %249 = sbr.rel (%p2846_p13) target bundleno = 845 (0x34d), region = 40  ;;  %s1676_s29 = sshll.u32 (!%p2846_p13), %s2254_s13, 10 }
  0x68   : > { %s252_s17 = scalar_lea.sflag (!%p2846_p13), [#allocation3], %s2254_s13  ;;  %s2260_s23 = scalar_lea.vmem (!%p2846_p13), [#allocation2], %s1676_s29 }
  0x6c   : > { %2036 = dma.done.wait (%p2847_p7), %s252_s17, 16384  }
  0x6d   : > { %2038 = vsyncadd (%p2847_p7), %s252_s17, 4294950912  ;;  %p2848_p10 = scmp.eq.s32.totalorder %s2133_s22, 0 }
  0x6f   : > { %2040 = dma.done.wait (%p2848_p10), [#allocation6], 2064   ;;  %p2849_p0 = pmov %p2848_p10 }
  0x71   : > { %2042 = vsyncadd (%p2849_p0), [#allocation6], 4294965232  ;;  %p2850_p1 = pmov %p2849_p0 }
  0x72   : > { %p2851_p2 = pmov %p2849_p0 }
  0x73   : > { %2044 = dma.done.wait (%p2850_p1), [#allocation9], 2080  }
  0x74   : > { %2046 = vsyncadd (%p2851_p2), [#allocation9], 4294965216  ;;  %v2078_v0 = vmov 0   ;;  %v1821_v1 = vld [vmem:[#allocation5 + $0x38] sm:$0xff]   ;;  %v1822_v2 = vld [vmem:[#allocation5 + $0x30] sm:$0xff]   ;;  %s2503_s24 = scalar_lea.vmem [#allocation11], %s1676_s29 }
  0x75   : > { %628 = vmatprep.subr.bf16.mxu0 %v2078_v0  ;;  %1089 = vmatprep.mubr.bf16.mxu1 %v2078_v0  ;;  %v1823_v3 = vld [vmem:[#allocation5 + $0x28] sm:$0xff]   ;;  %v1824_v4 = vld [vmem:[#allocation5 + $0x20] sm:$0xff]   ;;  %v1825_v5 = vld [vmem:[#allocation5 + $0x18] sm:$0xff]   ;;  %s1724_s26 = sshll.u32 %s2133_s22, 14  ;;  %s1553_s30 = sshll.u32 %s2503_s24, 4  ;;  %s2784_s30 = int_to_ptr.vmem [resolvable:$true] %s1553_s30 }
  0x76   : > { %629 = vmatpush1.bf16.msra.mxu0 %v1821_v1  ;;  %v302_v6 = vld [vmem:[%s2260_s23 + $0x8] sm:$0xff]  ;;  %v304_v7 = vld [vmem:[%s2260_s23 + $0x18] sm:$0xff]  ;;  %v1826_v9 = vld [vmem:[#allocation5 + $0x10] sm:$0xff]   ;;  %s2782_s9 = scalar_lea.hbm %s2834_s5, %s1724_s26  ;;  %s1539_s22 = scalar_lea.sflag [#allocation4], %s2254_s13 }
  0x77   : > { %630 = vmatprep.subr.bf16.mxu0 %v2078_v0  ;;  %v430_v8 = vpack.c.bf16 %v304_v7, %v302_v6  ;;  %v1827_v10 = vld [vmem:[#allocation5 + $0x8] sm:$0xff]   ;;  %v1828_v11 = vld [vmem:[#allocation5] sm:$0xff]   ;;  %v1829_v12 = vld [vmem:[#allocation5 + $0x78] sm:$0xff]   ;;  %s1993_s16 = scalar_lea.vmem %s2784_s30, 16384  ;;  %p2852_p8 = scmp.ne.s32.totalorder %s2844_s15, 0 }
  0x78   : > { %v1830_v13 = vld [vmem:[#allocation5 + $0x70] sm:$0xff]   ;;  %v1831_v14 = vld [vmem:[#allocation5 + $0x68] sm:$0xff]   ;;  %v1832_v15 = vld [vmem:[#allocation5 + $0x60] sm:$0xff]   ;;  %p1994_p4 = scmp.ne.s32.totalorder %s2784_s30, %s1993_s16  ;;  %s2079_s27 = smov [#allocation11]  }
  0x79   : > { %660 = vmatprep.mubr.bf16.mxu0 %v430_v8  ;;  %v1833_v16 = vld [vmem:[#allocation5 + $0x58] sm:$0xff]   ;;  %v1834_v17 = vld [vmem:[#allocation5 + $0x50] sm:$0xff]   ;;  %v1835_v18 = vld [vmem:[#allocation5 + $0x48] sm:$0xff]   ;;  %s1997_s28 = sshll.u32 %s2079_s27, 4  ;;  %s1998_s28 = int_to_ptr.vmem [resolvable:$false] %s1997_s28 }
  0x7a   : > { %631 = vmatpush1.bf16.msra.mxu0 %v1822_v2  ;;  %v1836_v19 = vld [vmem:[#allocation5 + $0x40] sm:$0xff]   ;;  %v303_v21 = vld [vmem:[%s2260_s23 + $0x10] sm:$0xff]  ;;  %v306_v22 = vld [vmem:[%s2260_s23 + $0x28] sm:$0xff]  ;;  %p1995_p11 = pnand %p1994_p4, %p2852_p8  ;;  %s1999_s7 = scalar_lea.vmem %s1998_s28, 32768 }
  0x7b   : > { %632 = vmatprep.subr.bf16.mxu0 %v2078_v0  ;;  %v301_v20 = vld [vmem:[%s2260_s23] sm:$0xff]  ;;  %v308_v23 = vld [vmem:[%s2260_s23 + $0x38] sm:$0xff]  ;;  %v307_v27 = vld [vmem:[%s2260_s23 + $0x30] sm:$0xff]  ;;  %p2000_p5 = scmp.lt.s32.totalorder %s2784_s30, %s1998_s28  ;;  %p2001_p9 = scmp.lt.s32.totalorder %s1999_s7, %s1993_s16 }
  0x7c   : > { %v429_v24 = vpack.c.bf16 %v303_v21, %v301_v20  ;;  %v432_v25 = vpack.c.bf16 %v308_v23, %v306_v22  ;;  %v305_v26 = vld [vmem:[%s2260_s23 + $0x20] sm:$0xff]  ;;  %v310_v28 = vld [vmem:[%s2260_s23 + $0x48] sm:$0xff]  ;;  %v312_v29 = vld [vmem:[%s2260_s23 + $0x58] sm:$0xff]  ;;  %p1996_p6 = pneg %p1995_p11 }
  0x7d   : > { %v431_v30 = vpack.c.bf16 %v307_v27, %v305_v26  ;;  %v434_v31 = vpack.c.bf16 %v312_v29, %v310_v28  ;;  %v309_v32 = vld [vmem:[%s2260_s23 + $0x40] sm:$0xff]  ;;  %v311_v33 = vld [vmem:[%s2260_s23 + $0x50] sm:$0xff]  ;;  %v314_v34 = vld [vmem:[%s2260_s23 + $0x68] sm:$0xff]  ;;  %p2002_p12 = por %p2001_p9, %p2000_p5 }
  0x7e   : > { %633 = vmatpush1.bf16.msra.mxu0 %v1823_v3  ;;  %v316_v35 = vld [vmem:[%s2260_s23 + $0x78] sm:$0xff]  ;;  %v433_v36 = vpack.c.bf16 %v311_v33, %v309_v32  ;;  %v313_v38 = vld [vmem:[%s2260_s23 + $0x60] sm:$0xff]  ;;  %v315_v39 = vld [vmem:[%s2260_s23 + $0x70] sm:$0xff] }
  0x7f   : > { %634 = vmatprep.subr.bf16.mxu0 %v2078_v0  ;;  %v436_v37 = vpack.c.bf16 %v316_v35, %v314_v34  ;;  %v318_v40 = vld [vmem:[%s2260_s23 + $0x88] sm:$0xff]  ;;  %v320_v41 = vld [vmem:[%s2260_s23 + $0x98] sm:$0xff]  ;;  %v435_v42 = vpack.c.bf16 %v315_v39, %v313_v38  ;;  %v317_v44 = vld [vmem:[%s2260_s23 + $0x80] sm:$0xff]  ;;  %p2003_p3 = pnand %p2002_p12, %p1996_p6 }
  0x80   : > { %v438_v43 = vpack.c.bf16 %v320_v41, %v318_v40  ;;  %v319_v45 = vld [vmem:[%s2260_s23 + $0x90] sm:$0xff]  ;;  %v322_v46 = vld [vmem:[%s2260_s23 + $0xa8] sm:$0xff]  ;;  %v324_v47 = vld [vmem:[%s2260_s23 + $0xb8] sm:$0xff] }
  0x81   : > { %v437_v48 = vpack.c.bf16 %v319_v45, %v317_v44  ;;  %v440_v49 = vpack.c.bf16 %v324_v47, %v322_v46  ;;  %v321_v50 = vld [vmem:[%s2260_s23 + $0xa0] sm:$0xff]  ;;  %v323_v51 = vld [vmem:[%s2260_s23 + $0xb0] sm:$0xff]  ;;  %v326_v52 = vld [vmem:[%s2260_s23 + $0xc8] sm:$0xff] }
  0x82   : > { %635 = vmatpush1.bf16.msra.mxu0 %v1824_v4  ;;  %v328_v53 = vld [vmem:[%s2260_s23 + $0xd8] sm:$0xff]  ;;  %v439_v54 = vpack.c.bf16 %v323_v51, %v321_v50  ;;  %v1840_v58 = vld [vmem:[#allocation8 + $0x64] ss:$8 sps:$4 sm:$0xff]   ;;  %v1842_v63 = vld [vmem:[#allocation8 + $0x60] ss:$8 sps:$4 sm:$0xff]  }
  0x83   : > { %636 = vmatprep.subr.bf16.mxu0 %v2078_v0  ;;  %v442_v55 = vpack.c.bf16 %v328_v53, %v326_v52  ;;  %v1837_v56 = vld [vmem:[#allocation8 + $0x74] ss:$8 sps:$4 sm:$0xff]   ;;  %v1839_v57 = vld [vmem:[#allocation8 + $0x70] ss:$8 sps:$4 sm:$0xff]   ;;  %v330_v61 = vld [vmem:[%s2260_s23 + $0xe8] sm:$0xff] }
  0x84   : > { %v325_v59 = vld [vmem:[%s2260_s23 + $0xc0] sm:$0xff]  ;;  %v327_v60 = vld [vmem:[%s2260_s23 + $0xd0] sm:$0xff]  ;;  %1057 = vmatprep.subr.bf16.mxu1 %v1837_v56  ;;  %v332_v62 = vld [vmem:[%s2260_s23 + $0xf8] sm:$0xff] }
  0x85   : > { %1058 = vmatpush1.bf16.msra.mxu1 %v1839_v57  ;;  %v441_v1 = vpack.c.bf16 %v327_v60, %v325_v59  ;;  %v444_v2 = vpack.c.bf16 %v332_v62, %v330_v61  ;;  %v1843_v3 = vld [vmem:[#allocation8 + $0x54] ss:$8 sps:$4 sm:$0xff]   ;;  %v1845_v4 = vld [vmem:[#allocation8 + $0x50] ss:$8 sps:$4 sm:$0xff]   ;;  %v334_v8 = vld [vmem:[%s2260_s23 + $0x108] sm:$0xff] }
  0x86   : > { %637 = vmatpush1.bf16.msra.mxu0 %v1825_v5  ;;  %1059 = vmatprep.subr.bf16.mxu1 %v1840_v58  ;;  %v1846_v5 = vld [vmem:[#allocation8 + $0x44] ss:$8 sps:$4 sm:$0xff]   ;;  %v1854_v20 = vld [vmem:[#allocation8 + $0x20] ss:$8 sps:$4 sm:$0xff]   ;;  %v1855_v23 = vld [vmem:[#allocation8 + $0x14] ss:$8 sps:$4 sm:$0xff]  }
  0x87   : > { %638 = vmatprep.subr.bf16.mxu0 %v2078_v0  ;;  %v329_v6 = vld [vmem:[%s2260_s23 + $0xe0] sm:$0xff]  ;;  %v331_v7 = vld [vmem:[%s2260_s23 + $0xf0] sm:$0xff]  ;;  %v342_v27 = vld [vmem:[%s2260_s23 + $0x148] sm:$0xff] }
  0x88   : > { %v339_v26 = vld [vmem:[%s2260_s23 + $0x130] sm:$0xff]  ;;  %v344_v28 = vld [vmem:[%s2260_s23 + $0x158] sm:$0xff]  ;;  %v341_v33 = vld [vmem:[%s2260_s23 + $0x140] sm:$0xff] }
  0x89   : > { %1060 = vmatpush1.bf16.msra.mxu1 %v1842_v63  ;;  %v1858_v29 = vld [vmem:[#allocation8 + $0x4] ss:$8 sps:$4 sm:$0xff]   ;;  %v450_v32 = vpack.c.bf16 %v344_v28, %v342_v27  ;;  %v364_v60 = vld [vmem:[%s2260_s23 + $0x1f8] sm:$0xff] }
  0x8a   : > { %639 = vmatpush1.bf16.msra.mxu0 %v1826_v9  ;;  %1061 = vmatprep.subr.bf16.mxu1 %v1843_v3  ;;  %v336_v9 = vld [vmem:[%s2260_s23 + $0x118] sm:$0xff]  ;;  %v343_v34 = vld [vmem:[%s2260_s23 + $0x150] sm:$0xff]  ;;  %v346_v35 = vld [vmem:[%s2260_s23 + $0x168] sm:$0xff] }
  0x8b   : > { %640 = vmatprep.subr.bf16.mxu0 %v2078_v0  ;;  %v345_v39 = vld [vmem:[%s2260_s23 + $0x160] sm:$0xff]  ;;  %v347_v40 = vld [vmem:[%s2260_s23 + $0x170] sm:$0xff]  ;;  %v350_v41 = vld [vmem:[%s2260_s23 + $0x188] sm:$0xff] }
  0x8c   : > { %v349_v45 = vld [vmem:[%s2260_s23 + $0x180] sm:$0xff]  ;;  %v351_v46 = vld [vmem:[%s2260_s23 + $0x190] sm:$0xff]  ;;  %v354_v47 = vld [vmem:[%s2260_s23 + $0x1a8] sm:$0xff] }
  0x8d   : > { %1062 = vmatpush1.bf16.msra.mxu1 %v1845_v4  ;;  %v353_v51 = vld [vmem:[%s2260_s23 + $0x1a0] sm:$0xff]  ;;  %v355_v52 = vld [vmem:[%s2260_s23 + $0x1b0] sm:$0xff]  ;;  %v358_v53 = vld [vmem:[%s2260_s23 + $0x1c8] sm:$0xff] }
  0x8e   : > { %641 = vmatpush1.bf16.msra.mxu0 %v1827_v10  ;;  %v1848_v10 = vld [vmem:[#allocation8 + $0x40] ss:$8 sps:$4 sm:$0xff]   ;;  %1063 = vmatprep.subr.bf16.mxu1 %v1846_v5  ;;  %v359_v58 = vld [vmem:[%s2260_s23 + $0x1d0] sm:$0xff]  ;;  %v368_v3 = vld [vmem:[%s2260_s23 + $0x218] sm:$0xff] }
  0x8f   : > { %642 = vmatprep.subr.bf16.mxu0 %v2078_v0  ;;  %v357_v57 = vld [vmem:[%s2260_s23 + $0x1c0] sm:$0xff]  ;;  %v362_v59 = vld [vmem:[%s2260_s23 + $0x1e8] sm:$0xff]  ;;  %v384_v27 = vld [vmem:[%s2260_s23 + $0x298] sm:$0xff] }
  0x90   : > { %v457_v61 = vpack.c.bf16 %v359_v58, %v357_v57  ;;  %v460_v62 = vpack.c.bf16 %v364_v60, %v362_v59  ;;  %v361_v63 = vld [vmem:[%s2260_s23 + $0x1e0] sm:$0xff]  ;;  %v404_v57 = vld [vmem:[%s2260_s23 + $0x338] sm:$0xff] }
  0x91   : > { %1064 = vmatpush1.bf16.msra.mxu1 %v1848_v10 }
  0x92   : > { %643 = vmatpush1.bf16.msra.mxu0 %v1828_v11  ;;  %v443_v11 = vpack.c.bf16 %v331_v7, %v329_v6  ;;  %v365_v6 = vld [vmem:[%s2260_s23 + $0x200] sm:$0xff]  ;;  %v367_v7 = vld [vmem:[%s2260_s23 + $0x210] sm:$0xff] }
  0x93   : > { %644 = vmatprep.subr.bf16.mxu0 %v2078_v0  ;;  %v461_v10 = vpack.c.bf16 %v367_v7, %v365_v6 }
  0x96   : > { %645 = vmatpush2.bf16.msra.mxu0 %v1829_v12  ;;  %v446_v12 = vpack.c.bf16 %v336_v9, %v334_v8  ;;  %v370_v8 = vld [vmem:[%s2260_s23 + $0x228] sm:$0xff]  ;;  %v372_v9 = vld [vmem:[%s2260_s23 + $0x238] sm:$0xff] }
  0x97   : > { %646 = vmatprep.subr.bf16.mxu0 %v2078_v0 }
  0x9a   : > { %647 = vmatpush2.bf16.msra.mxu0 %v1830_v13  ;;  %v1849_v13 = vld [vmem:[#allocation8 + $0x34] ss:$8 sps:$4 sm:$0xff]  }
  0x9b   : > { %648 = vmatprep.subr.bf16.mxu0 %v2078_v0  ;;  %1065 = vmatprep.subr.bf16.mxu1 %v1849_v13  ;;  %v371_v13 = vld [vmem:[%s2260_s23 + $0x230] sm:$0xff] }
  0x9e   : > { %649 = vmatpush2.bf16.msra.mxu0 %v1831_v14  ;;  %v1851_v14 = vld [vmem:[#allocation8 + $0x30] ss:$8 sps:$4 sm:$0xff]  }
  0x9f   : > { %650 = vmatprep.subr.bf16.mxu0 %v2078_v0  ;;  %1066 = vmatpush1.bf16.msra.mxu1 %v1851_v14  ;;  %v374_v14 = vld [vmem:[%s2260_s23 + $0x248] sm:$0xff] }
  0xa2   : > { %651 = vmatpush2.bf16.msra.mxu0 %v1832_v15  ;;  %v1852_v15 = vld [vmem:[#allocation8 + $0x24] ss:$8 sps:$4 sm:$0xff]  }
  0xa3   : > { %652 = vmatprep.subr.bf16.mxu0 %v2078_v0  ;;  %1067 = vmatprep.subr.bf16.mxu1 %v1852_v15  ;;  %v376_v15 = vld [vmem:[%s2260_s23 + $0x258] sm:$0xff] }
  0xa4   : > { %1068 = vmatpush1.bf16.msra.mxu1 %v1854_v20  ;;  %v378_v20 = vld [vmem:[%s2260_s23 + $0x268] sm:$0xff] }
  0xa5   : > { %1069 = vmatprep.subr.bf16.mxu1 %v1855_v23 }
  0xa6   : > { %653 = vmatpush2.bf16.msra.mxu0 %v1833_v16  ;;  %v333_v16 = vld [vmem:[%s2260_s23 + $0x100] sm:$0xff] }
  0xa7   : > { %654 = vmatprep.subr.bf16.mxu0 %v2078_v0 }
  0xaa   : > { %655 = vmatpush2.bf16.msra.mxu0 %v1834_v17  ;;  %v335_v17 = vld [vmem:[%s2260_s23 + $0x110] sm:$0xff] }
  0xab   : > { %656 = vmatprep.subr.bf16.mxu0 %v2078_v0  ;;  %v445_v21 = vpack.c.bf16 %v335_v17, %v333_v16  ;;  %v466_v17 = vpack.c.bf16 %v376_v15, %v374_v14  ;;  %v410_v15 = vld [vmem:[%s2260_s23 + $0x368] sm:$0xff] }
  0xae   : > { %657 = vmatpush2.bf16.msra.mxu0 %v1835_v18  ;;  %v338_v18 = vld [vmem:[%s2260_s23 + $0x128] sm:$0xff] }
  0xaf   : > { %658 = vmatprep.subr.bf16.mxu0 %v2078_v0 }
  0xb2   : > { %659 = vmatpush2.bf16.msra.mxu0 %v1836_v19  ;;  %v340_v19 = vld [vmem:[%s2260_s23 + $0x138] sm:$0xff] }
  0xb3   : > { %v448_v22 = vpack.c.bf16 %v340_v19, %v338_v18  ;;  %v373_v18 = vld [vmem:[%s2260_s23 + $0x240] sm:$0xff]  ;;  %v375_v19 = vld [vmem:[%s2260_s23 + $0x250] sm:$0xff] }
  0xb5   : > { %661 = vmatmul.mubr.bf16.vlgmr.msra.gmra.mxu0 %v429_v24  ;;  %v1857_v24 = vld [vmem:[#allocation8 + $0x10] ss:$8 sps:$4 sm:$0xff]  }
  0xb6   : > { %668 = vmatprep.mubr.bf16.mxu0 %v432_v25  ;;  %v337_v25 = vld [vmem:[%s2260_s23 + $0x120] sm:$0xff]  ;;  %1070 = vmatpush1.bf16.msra.mxu1 %v1857_v24 }
  0xb7   : > { %1071 = vmatprep.subr.bf16.mxu1 %v1858_v29  ;;  %v377_v24 = vld [vmem:[%s2260_s23 + $0x260] sm:$0xff] }
  0xbd   : > { %669 = vmatmul.mubr.bf16.gmra.mxu0 %v431_v30  ;;  %v447_v30 = vpack.c.bf16 %v339_v26, %v337_v25  ;;  %v379_v25 = vld [vmem:[%s2260_s23 + $0x270] sm:$0xff]  ;;  %v382_v26 = vld [vmem:[%s2260_s23 + $0x288] sm:$0xff] }
  0xbe   : > { %676 = vmatprep.mubr.bf16.mxu0 %v434_v31  ;;  %v1860_v31 = vld [vmem:[#allocation8] ss:$8 sps:$4 sm:$0xff]   ;;  %v467_v28 = vpack.c.bf16 %v379_v25, %v377_v24  ;;  %v470_v29 = vpack.c.bf16 %v384_v27, %v382_v26  ;;  %v411_v26 = vld [vmem:[%s2260_s23 + $0x370] sm:$0xff] }
  0xbf   : > { %1072 = vmatpush1.bf16.msra.mxu1 %v1860_v31  ;;  %v383_v31 = vld [vmem:[%s2260_s23 + $0x290] sm:$0xff]  ;;  %v409_v25 = vld [vmem:[%s2260_s23 + $0x360] sm:$0xff] }
  0xc5   : > { %677 = vmatmul.mubr.bf16.gmra.mxu0 %v433_v36  ;;  %v348_v36 = vld [vmem:[%s2260_s23 + $0x178] sm:$0xff] }
  0xc6   : > { %684 = vmatprep.mubr.bf16.mxu0 %v436_v37  ;;  %v449_v37 = vpack.c.bf16 %v343_v34, %v341_v33  ;;  %v452_v38 = vpack.c.bf16 %v348_v36, %v346_v35  ;;  %v388_v33 = vld [vmem:[%s2260_s23 + $0x2b8] sm:$0xff]  ;;  %v385_v36 = vld [vmem:[%s2260_s23 + $0x2a0] sm:$0xff] }
  0xcd   : > { %685 = vmatmul.mubr.bf16.gmra.mxu0 %v435_v42  ;;  %v352_v42 = vld [vmem:[%s2260_s23 + $0x198] sm:$0xff] }
  0xce   : > { %692 = vmatprep.mubr.bf16.mxu0 %v438_v43  ;;  %v451_v43 = vpack.c.bf16 %v347_v40, %v345_v39  ;;  %v454_v44 = vpack.c.bf16 %v352_v42, %v350_v41  ;;  %v392_v39 = vld [vmem:[%s2260_s23 + $0x2d8] sm:$0xff]  ;;  %v389_v42 = vld [vmem:[%s2260_s23 + $0x2c0] sm:$0xff] }
  0xd5   : > { %693 = vmatmul.mubr.bf16.gmra.mxu0 %v437_v48  ;;  %v356_v48 = vld [vmem:[%s2260_s23 + $0x1b8] sm:$0xff] }
  0xd6   : > { %700 = vmatprep.mubr.bf16.mxu0 %v440_v49  ;;  %v453_v49 = vpack.c.bf16 %v351_v46, %v349_v45  ;;  %v456_v50 = vpack.c.bf16 %v356_v48, %v354_v47  ;;  %v396_v45 = vld [vmem:[%s2260_s23 + $0x2f8] sm:$0xff]  ;;  %v393_v48 = vld [vmem:[%s2260_s23 + $0x2e0] sm:$0xff] }
  0xdd   : > { %701 = vmatmul.mubr.bf16.gmra.mxu0 %v439_v54  ;;  %v360_v54 = vld [vmem:[%s2260_s23 + $0x1d8] sm:$0xff] }
  0xde   : > { %708 = vmatprep.mubr.bf16.mxu0 %v442_v55  ;;  %v455_v55 = vpack.c.bf16 %v355_v52, %v353_v51  ;;  %v458_v56 = vpack.c.bf16 %v360_v54, %v358_v53  ;;  %v400_v51 = vld [vmem:[%s2260_s23 + $0x318] sm:$0xff]  ;;  %v397_v54 = vld [vmem:[%s2260_s23 + $0x300] sm:$0xff] }
  0xe5   : > { %709 = vmatmul.mubr.bf16.gmra.mxu0 %v441_v1  ;;  %v363_v1 = vld [vmem:[%s2260_s23 + $0x1f0] sm:$0xff] }
  0xe6   : > { %716 = vmatprep.mubr.bf16.mxu0 %v444_v2  ;;  %v366_v2 = vld [vmem:[%s2260_s23 + $0x208] sm:$0xff]  ;;  %v459_v4 = vpack.c.bf16 %v363_v1, %v361_v63  ;;  %v2395_v63 = vld [vmem:[#allocation7] ss:$0 sm:$0xff] }
  0xe7   : > { %v462_v5 = vpack.c.bf16 %v368_v3, %v366_v2  ;;  %v406_v2 = vld [vmem:[%s2260_s23 + $0x348] sm:$0xff]  ;;  %v408_v3 = vld [vmem:[%s2260_s23 + $0x358] sm:$0xff] }
  0xed   : > { %717 = vmatmul.mubr.bf16.gmra.mxu0 %v443_v11  ;;  %v464_v11 = vpack.c.bf16 %v372_v9, %v370_v8  ;;  %v482_v8 = vpack.c.bf16 %v408_v3, %v406_v2  ;;  %v421_v2 = vld [vmem:[%s2260_s23 + $0x3c0] sm:$0xff]  ;;  %v423_v3 = vld [vmem:[%s2260_s23 + $0x3d0] sm:$0xff] }
  0xee   : > { %724 = vmatprep.mubr.bf16.mxu0 %v446_v12  ;;  %v369_v12 = vld [vmem:[%s2260_s23 + $0x220] sm:$0xff] }
  0xef   : > { %v463_v16 = vpack.c.bf16 %v371_v13, %v369_v12  ;;  %v405_v12 = vld [vmem:[%s2260_s23 + $0x340] sm:$0xff]  ;;  %v407_v13 = vld [vmem:[%s2260_s23 + $0x350] sm:$0xff] }
  0xf5   : > { %725 = vmatmul.mubr.bf16.gmra.mxu0 %v445_v21  ;;  %v380_v21 = vld [vmem:[%s2260_s23 + $0x278] sm:$0xff] }
  0xf6   : > { %732 = vmatprep.mubr.bf16.mxu0 %v448_v22  ;;  %v465_v22 = vpack.c.bf16 %v375_v19, %v373_v18  ;;  %v468_v23 = vpack.c.bf16 %v380_v21, %v378_v20  ;;  %v481_v18 = vpack.c.bf16 %v407_v13, %v405_v12 }
  0xfd   : > { %733 = vmatmul.mubr.bf16.gmra.mxu0 %v447_v30  ;;  %v381_v30 = vld [vmem:[%s2260_s23 + $0x280] sm:$0xff] }
  0xfe   : > { %740 = vmatprep.mubr.bf16.mxu0 %v450_v32  ;;  %v386_v32 = vld [vmem:[%s2260_s23 + $0x2a8] sm:$0xff]  ;;  %v469_v34 = vpack.c.bf16 %v383_v31, %v381_v30  ;;  %v483_v31 = vpack.c.bf16 %v411_v26, %v409_v25 }
  0xff   : > { %v472_v35 = vpack.c.bf16 %v388_v33, %v386_v32 }
 0x105   : > { %741 = vmatmul.mubr.bf16.gmra.mxu0 %v449_v37  ;;  %v387_v37 = vld [vmem:[%s2260_s23 + $0x2b0] sm:$0xff] }
 0x106   : > { %748 = vmatprep.mubr.bf16.mxu0 %v452_v38  ;;  %v390_v38 = vld [vmem:[%s2260_s23 + $0x2c8] sm:$0xff]  ;;  %v471_v40 = vpack.c.bf16 %v387_v37, %v385_v36 }
 0x107   : > { %v474_v41 = vpack.c.bf16 %v392_v39, %v390_v38  ;;  %v413_v38 = vld [vmem:[%s2260_s23 + $0x380] sm:$0xff]  ;;  %v415_v39 = vld [vmem:[%s2260_s23 + $0x390] sm:$0xff] }
 0x10d   : > { %749 = vmatmul.mubr.bf16.gmra.mxu0 %v451_v43  ;;  %v391_v43 = vld [vmem:[%s2260_s23 + $0x2d0] sm:$0xff] }
 0x10e   : > { %756 = vmatprep.mubr.bf16.mxu0 %v454_v44  ;;  %v394_v44 = vld [vmem:[%s2260_s23 + $0x2e8] sm:$0xff]  ;;  %v473_v46 = vpack.c.bf16 %v391_v43, %v389_v42  ;;  %v420_v42 = vld [vmem:[%s2260_s23 + $0x3b8] sm:$0xff] }
 0x10f   : > { %v476_v47 = vpack.c.bf16 %v396_v45, %v394_v44  ;;  %v485_v44 = vpack.c.bf16 %v415_v39, %v413_v38 }
 0x115   : > { %757 = vmatmul.mubr.bf16.gmra.mxu0 %v453_v49  ;;  %v395_v49 = vld [vmem:[%s2260_s23 + $0x2f0] sm:$0xff] }
 0x116   : > { %764 = vmatprep.mubr.bf16.mxu0 %v456_v50  ;;  %v398_v50 = vld [vmem:[%s2260_s23 + $0x308] sm:$0xff]  ;;  %v475_v52 = vpack.c.bf16 %v395_v49, %v393_v48 }
 0x117   : > { %v478_v53 = vpack.c.bf16 %v400_v51, %v398_v50  ;;  %v417_v51 = vld [vmem:[%s2260_s23 + $0x3a0] sm:$0xff] }
 0x11d   : > { %765 = vmatmul.mubr.bf16.gmra.mxu0 %v455_v55  ;;  %v399_v55 = vld [vmem:[%s2260_s23 + $0x310] sm:$0xff] }
 0x11e   : > { %772 = vmatprep.mubr.bf16.mxu0 %v458_v56  ;;  %v402_v56 = vld [vmem:[%s2260_s23 + $0x328] sm:$0xff]  ;;  %v477_v58 = vpack.c.bf16 %v399_v55, %v397_v54  ;;  %v424_v55 = vld [vmem:[%s2260_s23 + $0x3d8] sm:$0xff] }
 0x11f   : > { %v480_v59 = vpack.c.bf16 %v404_v57, %v402_v56  ;;  %v422_v54 = vld [vmem:[%s2260_s23 + $0x3c8] sm:$0xff] }
 0x125   : > { %773 = vmatmul.mubr.bf16.gmra.mxu0 %v457_v61  ;;  %v401_v61 = vld [vmem:[%s2260_s23 + $0x320] sm:$0xff] }
 0x126   : > { %780 = vmatprep.mubr.bf16.mxu0 %v460_v62  ;;  %v403_v62 = vld [vmem:[%s2260_s23 + $0x330] sm:$0xff] }
 0x12d   : > { %781 = vmatmul.mubr.bf16.gmra.mxu0 %v459_v4 }
 0x12e   : > { %788 = vmatprep.mubr.bf16.mxu0 %v462_v5  ;;  %v479_v5 = vpack.c.bf16 %v403_v62, %v401_v61 }
 0x135   : > { %789 = vmatmul.mubr.bf16.gmra.mxu0 %v461_v10 }
 0x136   : > { %796 = vmatprep.mubr.bf16.mxu0 %v464_v11 }
 0x13d   : > { %797 = vmatmul.mubr.bf16.gmra.mxu0 %v463_v16  ;;  %v412_v16 = vld [vmem:[%s2260_s23 + $0x378] sm:$0xff] }
 0x13e   : > { %804 = vmatprep.mubr.bf16.mxu0 %v466_v17  ;;  %v484_v21 = vpack.c.bf16 %v412_v16, %v410_v15  ;;  %v425_v15 = vld [vmem:[%s2260_s23 + $0x3e0] sm:$0xff]  ;;  %v427_v16 = vld [vmem:[%s2260_s23 + $0x3f0] sm:$0xff] }
 0x145   : > { %805 = vmatmul.mubr.bf16.gmra.mxu0 %v465_v22 }
 0x146   : > { %812 = vmatprep.mubr.bf16.mxu0 %v468_v23 }
 0x14d   : > { %813 = vmatmul.mubr.bf16.gmra.mxu0 %v467_v28  ;;  %v414_v28 = vld [vmem:[%s2260_s23 + $0x388] sm:$0xff] }
 0x14e   : > { %820 = vmatprep.mubr.bf16.mxu0 %v470_v29  ;;  %v416_v29 = vld [vmem:[%s2260_s23 + $0x398] sm:$0xff] }
 0x155   : > { %821 = vmatmul.mubr.bf16.gmra.mxu0 %v469_v34  ;;  %v486_v34 = vpack.c.bf16 %v416_v29, %v414_v28 }
 0x156   : > { %828 = vmatprep.mubr.bf16.mxu0 %v472_v35 }
 0x15d   : > { %829 = vmatmul.mubr.bf16.gmra.mxu0 %v471_v40 }
 0x15e   : > { %836 = vmatprep.mubr.bf16.mxu0 %v474_v41  ;;  %v418_v41 = vld [vmem:[%s2260_s23 + $0x3a8] sm:$0xff] }
 0x165   : > { %837 = vmatmul.mubr.bf16.gmra.mxu0 %v473_v46 }
 0x166   : > { %844 = vmatprep.mubr.bf16.mxu0 %v476_v47  ;;  %v488_v47 = vpack.c.bf16 %v420_v42, %v418_v41 }
 0x16d   : > { %845 = vmatmul.mubr.bf16.gmra.mxu0 %v475_v52  ;;  %v419_v52 = vld [vmem:[%s2260_s23 + $0x3b0] sm:$0xff] }
 0x16e   : > { %852 = vmatprep.mubr.bf16.mxu0 %v478_v53  ;;  %v487_v57 = vpack.c.bf16 %v419_v52, %v417_v51 }
 0x175   : > { %v662_v60 = vpop.f32.mrf.mxu0  ;;  %853 = vmatmul.mubr.bf16.gmra.mxu0 %v477_v58 }
 0x176   : > { %860 = vmatprep.mubr.bf16.mxu0 %v480_v59  ;;  %v663_v6 = vadd.f32 %v2395_v63, %v662_v60  ;;  %v490_v60 = vpack.c.bf16 %v424_v55, %v422_v54 }
 0x177   : > { %v664_v1 = vpop.f32.mrf.mxu0 }
 0x179   : > { %v665_v4 = vpop.f32.mrf.mxu0 }
 0x17a   : > { %v666_v7 = vadd.f32 %v2395_v63, %v665_v4 }
 0x17b   : > { %v667_v9 = vpop.f32.mrf.mxu0 }
 0x17c   : > { %v917_v10 = vpack.c.bf16 %v666_v7, %v663_v6  ;;  %v428_v6 = vld [vmem:[%s2260_s23 + $0x3f8] sm:$0xff] }
 0x17d   : > { %v670_v11 = vpop.f32.mrf.mxu0  ;;  %861 = vmatmul.mubr.bf16.gmra.mxu0 %v479_v5  ;;  %v426_v5 = vld [vmem:[%s2260_s23 + $0x3e8] sm:$0xff] }
 0x17e   : > { %1090 = vmatmul.mubr.bf16.vlgmr.msra.gmra.mxu1 %v917_v10  ;;  %868 = vmatprep.mubr.bf16.mxu0 %v482_v8  ;;  %v671_v19 = vadd.f32 %v2395_v63, %v670_v11  ;;  %v489_v8 = vpack.c.bf16 %v423_v3, %v421_v2  ;;  %v492_v11 = vpack.c.bf16 %v428_v6, %v426_v5 }
 0x17f   : > { %v672_v14 = vpop.f32.mrf.mxu0  ;;  %1099 = vmatprep.mubr.bf16.mxu1 %v2078_v0 }
 0x181   : > { %v673_v17 = vpop.f32.mrf.mxu0 }
 0x182   : > { %v674_v20 = vadd.f32 %v2395_v63, %v673_v17 }
 0x183   : > { %v675_v22 = vpop.f32.mrf.mxu0 }
 0x184   : > { %v918_v23 = vpack.c.bf16 %v674_v20, %v671_v19  ;;  %v491_v19 = vpack.c.bf16 %v427_v16, %v425_v15 }
 0x185   : > { %v678_v24 = vpop.f32.mrf.mxu0  ;;  %869 = vmatmul.mubr.bf16.gmra.mxu0 %v481_v18 }
 0x186   : > { %1100 = vmatmul.mubr.bf16.gmra.mxu1 %v918_v23  ;;  %876 = vmatprep.mubr.bf16.mxu0 %v484_v21  ;;  %v679_v32 = vadd.f32 %v2395_v63, %v678_v24 }
 0x187   : > { %v680_v27 = vpop.f32.mrf.mxu0  ;;  %1109 = vmatprep.mubr.bf16.mxu1 %v2078_v0 }
 0x189   : > { %v681_v30 = vpop.f32.mrf.mxu0 }
 0x18a   : > { %v682_v33 = vadd.f32 %v2395_v63, %v681_v30 }
 0x18b   : > { %v683_v35 = vpop.f32.mrf.mxu0 }
 0x18c   : > { %v919_v36 = vpack.c.bf16 %v682_v33, %v679_v32 }
 0x18d   : > { %v686_v37 = vpop.f32.mrf.mxu0  ;;  %877 = vmatmul.mubr.bf16.gmra.mxu0 %v483_v31 }
 0x18e   : > { %1110 = vmatmul.mubr.bf16.gmra.mxu1 %v919_v36  ;;  %884 = vmatprep.mubr.bf16.mxu0 %v486_v34  ;;  %v687_v45 = vadd.f32 %v2395_v63, %v686_v37 }
 0x18f   : > { %v688_v40 = vpop.f32.mrf.mxu0  ;;  %1119 = vmatprep.mubr.bf16.mxu1 %v2078_v0 }
 0x191   : > { %v689_v43 = vpop.f32.mrf.mxu0 }
 0x192   : > { %v690_v46 = vadd.f32 %v2395_v63, %v689_v43 }
 0x193   : > { %v691_v48 = vpop.f32.mrf.mxu0 }
 0x194   : > { %v920_v49 = vpack.c.bf16 %v690_v46, %v687_v45 }
 0x195   : > { %v694_v50 = vpop.f32.mrf.mxu0  ;;  %885 = vmatmul.mubr.bf16.gmra.mxu0 %v485_v44 }
 0x196   : > { %1120 = vmatmul.mubr.bf16.gmra.mxu1 %v920_v49  ;;  %892 = vmatprep.mubr.bf16.mxu0 %v488_v47  ;;  %v695_v58 = vadd.f32 %v2395_v63, %v694_v50 }
 0x197   : > { %v696_v53 = vpop.f32.mrf.mxu0  ;;  %1129 = vmatprep.mubr.bf16.mxu1 %v2078_v0 }
 0x199   : > { %v697_v56 = vpop.f32.mrf.mxu0 }
 0x19a   : > { %v698_v59 = vadd.f32 %v2395_v63, %v697_v56 }
 0x19b   : > { %v699_v61 = vpop.f32.mrf.mxu0 }
 0x19c   : > { %v921_v62 = vpack.c.bf16 %v698_v59, %v695_v58 }
 0x19d   : > { %v702_v1 = vpop.f32.mrf.mxu0  ;;  %893 = vmatmul.mubr.bf16.gmra.mxu0 %v487_v57 }
 0x19e   : > { %1130 = vmatmul.mubr.bf16.gmra.mxu1 %v921_v62  ;;  %900 = vmatprep.mubr.bf16.mxu0 %v490_v60  ;;  %v703_v9 = vadd.f32 %v2395_v63, %v702_v1 }
 0x19f   : > { %v704_v4 = vpop.f32.mrf.mxu0  ;;  %1139 = vmatprep.mubr.bf16.mxu1 %v2078_v0 }
 0x1a1   : > { %v705_v7 = vpop.f32.mrf.mxu0 }
 0x1a2   : > { %v706_v10 = vadd.f32 %v2395_v63, %v705_v7 }
 0x1a3   : > { %v707_v12 = vpop.f32.mrf.mxu0 }
 0x1a4   : > { %v922_v13 = vpack.c.bf16 %v706_v10, %v703_v9 }
 0x1a5   : > { %v710_v14 = vpop.f32.mrf.mxu0  ;;  %901 = vmatmul.mubr.bf16.gmra.mxu0 %v489_v8 }
 0x1a6   : > { %1140 = vmatmul.mubr.bf16.gmra.mxu1 %v922_v13  ;;  %908 = vmatprep.mubr.bf16.mxu0 %v492_v11  ;;  %v711_v20 = vadd.f32 %v2395_v63, %v710_v14 }
 0x1a7   : > { %v712_v17 = vpop.f32.mrf.mxu0  ;;  %1149 = vmatprep.mubr.bf16.mxu1 %v2078_v0 }
 0x1a9   : > { %v713_v18 = vpop.f32.mrf.mxu0 }
 0x1aa   : > { %v714_v21 = vadd.f32 %v2395_v63, %v713_v18 }
 0x1ab   : > { %v715_v22 = vpop.f32.mrf.mxu0 }
 0x1ac   : > { %v923_v23 = vpack.c.bf16 %v714_v21, %v711_v20 }
 0x1ad   : > { %v718_v24 = vpop.f32.mrf.mxu0  ;;  %909 = vmatmul.mubr.bf16.gmra.mxu0 %v491_v19 }
 0x1ae   : > { %1150 = vmatmul.mubr.bf16.gmra.mxu1 %v923_v23  ;;  %v719_v27 = vadd.f32 %v2395_v63, %v718_v24 }
 0x1af   : > { %v720_v25 = vpop.f32.mrf.mxu0  ;;  %1159 = vmatprep.mubr.bf16.mxu1 %v2078_v0 }
 0x1b1   : > { %v721_v26 = vpop.f32.mrf.mxu0 }
 0x1b2   : > { %v722_v28 = vadd.f32 %v2395_v63, %v721_v26 }
 0x1b3   : > { %v723_v29 = vpop.f32.mrf.mxu0 }
 0x1b4   : > { %v924_v30 = vpack.c.bf16 %v722_v28, %v719_v27 }
 0x1b5   : > { %v726_v31 = vpop.f32.mrf.mxu0 }
 0x1b6   : > { %1160 = vmatmul.mubr.bf16.gmra.mxu1 %v924_v30  ;;  %v727_v34 = vadd.f32 %v2395_v63, %v726_v31 }
 0x1b7   : > { %v728_v32 = vpop.f32.mrf.mxu0  ;;  %1169 = vmatprep.mubr.bf16.mxu1 %v2078_v0 }
 0x1b9   : > { %v729_v33 = vpop.f32.mrf.mxu0 }
 0x1ba   : > { %v730_v35 = vadd.f32 %v2395_v63, %v729_v33 }
 0x1bb   : > { %v731_v36 = vpop.f32.mrf.mxu0 }
 0x1bc   : > { %v925_v37 = vpack.c.bf16 %v730_v35, %v727_v34 }
 0x1bd   : > { %v734_v38 = vpop.f32.mrf.mxu0 }
 0x1be   : > { %1170 = vmatmul.mubr.bf16.gmra.mxu1 %v925_v37  ;;  %v735_v41 = vadd.f32 %v2395_v63, %v734_v38 }
 0x1bf   : > { %v736_v39 = vpop.f32.mrf.mxu0  ;;  %1179 = vmatprep.mubr.bf16.mxu1 %v2078_v0 }
 0x1c1   : > { %v737_v40 = vpop.f32.mrf.mxu0 }
 0x1c2   : > { %v738_v42 = vadd.f32 %v2395_v63, %v737_v40 }
 0x1c3   : > { %v739_v43 = vpop.f32.mrf.mxu0 }
 0x1c4   : > { %v926_v44 = vpack.c.bf16 %v738_v42, %v735_v41 }
 0x1c5   : > { %v742_v45 = vpop.f32.mrf.mxu0 }
 0x1c6   : > { %1180 = vmatmul.mubr.bf16.gmra.mxu1 %v926_v44  ;;  %v743_v48 = vadd.f32 %v2395_v63, %v742_v45 }
 0x1c7   : > { %v744_v46 = vpop.f32.mrf.mxu0  ;;  %1189 = vmatprep.mubr.bf16.mxu1 %v2078_v0 }
 0x1c9   : > { %v745_v47 = vpop.f32.mrf.mxu0 }
 0x1ca   : > { %v746_v49 = vadd.f32 %v2395_v63, %v745_v47 }
 0x1cb   : > { %v747_v50 = vpop.f32.mrf.mxu0 }
 0x1cc   : > { %v927_v51 = vpack.c.bf16 %v746_v49, %v743_v48 }
 0x1cd   : > { %v750_v52 = vpop.f32.mrf.mxu0 }
 0x1ce   : > { %1190 = vmatmul.mubr.bf16.gmra.mxu1 %v927_v51  ;;  %v751_v55 = vadd.f32 %v2395_v63, %v750_v52 }
 0x1cf   : > { %v752_v53 = vpop.f32.mrf.mxu0  ;;  %1199 = vmatprep.mubr.bf16.mxu1 %v2078_v0 }
 0x1d1   : > { %v753_v54 = vpop.f32.mrf.mxu0 }
 0x1d2   : > { %v754_v56 = vadd.f32 %v2395_v63, %v753_v54 }
 0x1d3   : > { %v755_v57 = vpop.f32.mrf.mxu0 }
 0x1d4   : > { %v928_v58 = vpack.c.bf16 %v754_v56, %v751_v55 }
 0x1d5   : > { %v758_v59 = vpop.f32.mrf.mxu0 }
 0x1d6   : > { %1200 = vmatmul.mubr.bf16.gmra.mxu1 %v928_v58  ;;  %v759_v62 = vadd.f32 %v2395_v63, %v758_v59 }
 0x1d7   : > { %v760_v60 = vpop.f32.mrf.mxu0  ;;  %1209 = vmatprep.mubr.bf16.mxu1 %v2078_v0 }
 0x1d9   : > { %v761_v61 = vpop.f32.mrf.mxu0 }
 0x1da   : > { %v762_v1 = vadd.f32 %v2395_v63, %v761_v61 }
 0x1db   : > { %v763_v2 = vpop.f32.mrf.mxu0 }
 0x1dc   : > { %v929_v3 = vpack.c.bf16 %v762_v1, %v759_v62 }
 0x1dd   : > { %v766_v4 = vpop.f32.mrf.mxu0 }
 0x1de   : > { %1210 = vmatmul.mubr.bf16.gmra.mxu1 %v929_v3  ;;  %v767_v7 = vadd.f32 %v2395_v63, %v766_v4 }
 0x1df   : > { %v768_v5 = vpop.f32.mrf.mxu0  ;;  %1219 = vmatprep.mubr.bf16.mxu1 %v2078_v0 }
 0x1e1   : > { %v769_v6 = vpop.f32.mrf.mxu0 }
 0x1e2   : > { %v770_v8 = vadd.f32 %v2395_v63, %v769_v6 }
 0x1e3   : > { %v771_v9 = vpop.f32.mrf.mxu0 }
 0x1e4   : > { %v930_v10 = vpack.c.bf16 %v770_v8, %v767_v7 }
 0x1e5   : > { %v774_v11 = vpop.f32.mrf.mxu0 }
 0x1e6   : > { %1220 = vmatmul.mubr.bf16.gmra.mxu1 %v930_v10  ;;  %v775_v14 = vadd.f32 %v2395_v63, %v774_v11 }
 0x1e7   : > { %v776_v12 = vpop.f32.mrf.mxu0  ;;  %1229 = vmatprep.mubr.bf16.mxu1 %v2078_v0 }
 0x1e9   : > { %v777_v13 = vpop.f32.mrf.mxu0 }
 0x1ea   : > { %v778_v15 = vadd.f32 %v2395_v63, %v777_v13 }
 0x1eb   : > { %v779_v16 = vpop.f32.mrf.mxu0 }
 0x1ec   : > { %v931_v17 = vpack.c.bf16 %v778_v15, %v775_v14  ;;  %v967_v14 = vlaneseq }
 0x1ed   : > { %v782_v18 = vpop.f32.mrf.mxu0 }
 0x1ee   : > { %1230 = vmatmul.mubr.bf16.gmra.mxu1 %v931_v17  ;;  %v783_v21 = vadd.f32 %v2395_v63, %v782_v18 }
 0x1ef   : > { %v784_v19 = vpop.f32.mrf.mxu0  ;;  %1239 = vmatprep.mubr.bf16.mxu1 %v2078_v0 }
 0x1f0   : > { %v968_v19 = vshrl.u32 %v967_v14, 7 }
 0x1f1   : > { %v785_v20 = vpop.f32.mrf.mxu0 }
 0x1f2   : > { %v786_v22 = vadd.f32 %v2395_v63, %v785_v20 }
 0x1f3   : > { %v787_v23 = vpop.f32.mrf.mxu0 }
 0x1f4   : > { %v932_v24 = vpack.c.bf16 %v786_v22, %v783_v21  ;;  %v969_v23 = vsub.s32 0, %v968_v19 }
 0x1f5   : > { %v790_v25 = vpop.f32.mrf.mxu0 }
 0x1f6   : > { %1240 = vmatmul.mubr.bf16.gmra.mxu1 %v932_v24  ;;  %v791_v28 = vadd.f32 %v2395_v63, %v790_v25  ;;  %v965_v24 = vld [vmem:[#allocation10] sm:$0x3] }
 0x1f7   : > { %v792_v26 = vpop.f32.mrf.mxu0  ;;  %1249 = vmatprep.mubr.bf16.mxu1 %v2078_v0 }
 0x1f8   : > { %v973_v26 = vsub.s32 1, %v968_v19 }
 0x1f9   : > { %v793_v27 = vpop.f32.mrf.mxu0 }
 0x1fa   : > { %v794_v29 = vadd.f32 %v2395_v63, %v793_v27 }
 0x1fb   : > { %v795_v30 = vpop.f32.mrf.mxu0 }
 0x1fc   : > { %v933_v31 = vpack.c.bf16 %v794_v29, %v791_v28  ;;  %v2495_v30 = vrot.slane %v965_v24, %v969_v23 }
 0x1fd   : > { %v798_v32 = vpop.f32.mrf.mxu0 }
 0x1fe   : > { %1250 = vmatmul.mubr.bf16.gmra.mxu1 %v933_v31  ;;  %v799_v35 = vadd.f32 %v2395_v63, %v798_v32 }
 0x1ff   : > { %v800_v33 = vpop.f32.mrf.mxu0  ;;  %1259 = vmatprep.mubr.bf16.mxu1 %v2078_v0 }
 0x200   : > { %v2497_v33 = vrot.slane %v965_v24, %v973_v26 }
 0x201   : > { %v801_v34 = vpop.f32.mrf.mxu0 }
 0x202   : > { %v802_v36 = vadd.f32 %v2395_v63, %v801_v34 }
 0x203   : > { %v803_v37 = vpop.f32.mrf.mxu0 }
 0x204   : > { %v934_v38 = vpack.c.bf16 %v802_v36, %v799_v35 }
 0x205   : > { %v806_v39 = vpop.f32.mrf.mxu0 }
 0x206   : > { %1260 = vmatmul.mubr.bf16.gmra.mxu1 %v934_v38  ;;  %v807_v42 = vadd.f32 %v2395_v63, %v806_v39 }
 0x207   : > { %v808_v40 = vpop.f32.mrf.mxu0  ;;  %1269 = vmatprep.mubr.bf16.mxu1 %v2078_v0 }
 0x209   : > { %v809_v41 = vpop.f32.mrf.mxu0 }
 0x20a   : > { %v810_v43 = vadd.f32 %v2395_v63, %v809_v41 }
 0x20b   : > { %v811_v44 = vpop.f32.mrf.mxu0 }
 0x20c   : > { %v935_v45 = vpack.c.bf16 %v810_v43, %v807_v42 }
 0x20d   : > { %v814_v46 = vpop.f32.mrf.mxu0 }
 0x20e   : > { %1270 = vmatmul.mubr.bf16.gmra.mxu1 %v935_v45  ;;  %v815_v49 = vadd.f32 %v2395_v63, %v814_v46 }
 0x20f   : > { %v816_v47 = vpop.f32.mrf.mxu0  ;;  %1279 = vmatprep.mubr.bf16.mxu1 %v2078_v0 }
 0x211   : > { %v817_v48 = vpop.f32.mrf.mxu0 }
 0x212   : > { %v818_v50 = vadd.f32 %v2395_v63, %v817_v48 }
 0x213   : > { %v819_v51 = vpop.f32.mrf.mxu0 }
 0x214   : > { %v936_v52 = vpack.c.bf16 %v818_v50, %v815_v49 }
 0x215   : > { %v822_v53 = vpop.f32.mrf.mxu0 }
 0x216   : > { %1280 = vmatmul.mubr.bf16.gmra.mxu1 %v936_v52  ;;  %v823_v56 = vadd.f32 %v2395_v63, %v822_v53 }
 0x217   : > { %v824_v54 = vpop.f32.mrf.mxu0  ;;  %1289 = vmatprep.mubr.bf16.mxu1 %v2078_v0 }
 0x219   : > { %v825_v55 = vpop.f32.mrf.mxu0 }
 0x21a   : > { %v826_v57 = vadd.f32 %v2395_v63, %v825_v55 }
 0x21b   : > { %v827_v58 = vpop.f32.mrf.mxu0 }
 0x21c   : > { %v937_v59 = vpack.c.bf16 %v826_v57, %v823_v56 }
 0x21d   : > { %v830_v60 = vpop.f32.mrf.mxu0 }
 0x21e   : > { %1290 = vmatmul.mubr.bf16.gmra.mxu1 %v937_v59  ;;  %v831_v1 = vadd.f32 %v2395_v63, %v830_v60 }
 0x21f   : > { %v832_v61 = vpop.f32.mrf.mxu0  ;;  %1299 = vmatprep.mubr.bf16.mxu1 %v2078_v0 }
 0x221   : > { %v833_v62 = vpop.f32.mrf.mxu0 }
 0x222   : > { %v834_v2 = vadd.f32 %v2395_v63, %v833_v62 }
 0x223   : > { %v835_v3 = vpop.f32.mrf.mxu0 }
 0x224   : > { %v938_v4 = vpack.c.bf16 %v834_v2, %v831_v1 }
 0x225   : > { %v838_v5 = vpop.f32.mrf.mxu0 }
 0x226   : > { %1300 = vmatmul.mubr.bf16.gmra.mxu1 %v938_v4  ;;  %v839_v8 = vadd.f32 %v2395_v63, %v838_v5 }
 0x227   : > { %v840_v6 = vpop.f32.mrf.mxu0  ;;  %1309 = vmatprep.mubr.bf16.mxu1 %v2078_v0 }
 0x229   : > { %v841_v7 = vpop.f32.mrf.mxu0 }
 0x22a   : > { %v842_v9 = vadd.f32 %v2395_v63, %v841_v7 }
 0x22b   : > { %v843_v10 = vpop.f32.mrf.mxu0 }
 0x22c   : > { %v939_v11 = vpack.c.bf16 %v842_v9, %v839_v8 }
 0x22d   : > { %v846_v12 = vpop.f32.mrf.mxu0 }
 0x22e   : > { %1310 = vmatmul.mubr.bf16.gmra.mxu1 %v939_v11  ;;  %v847_v16 = vadd.f32 %v2395_v63, %v846_v12 }
 0x22f   : > { %v848_v13 = vpop.f32.mrf.mxu0  ;;  %1319 = vmatprep.mubr.bf16.mxu1 %v2078_v0 }
 0x231   : > { %v849_v15 = vpop.f32.mrf.mxu0 }
 0x232   : > { %v850_v17 = vadd.f32 %v2395_v63, %v849_v15 }
 0x233   : > { %v851_v18 = vpop.f32.mrf.mxu0 }
 0x234   : > { %v940_v20 = vpack.c.bf16 %v850_v17, %v847_v16 }
 0x235   : > { %v854_v21 = vpop.f32.mrf.mxu0 }
 0x236   : > { %1320 = vmatmul.mubr.bf16.gmra.mxu1 %v940_v20  ;;  %v855_v27 = vadd.f32 %v2395_v63, %v854_v21 }
 0x237   : > { %v856_v22 = vpop.f32.mrf.mxu0  ;;  %1329 = vmatprep.mubr.bf16.mxu1 %v2078_v0 }
 0x239   : > { %v857_v25 = vpop.f32.mrf.mxu0 }
 0x23a   : > { %v858_v28 = vadd.f32 %v2395_v63, %v857_v25 }
 0x23b   : > { %v859_v29 = vpop.f32.mrf.mxu0 }
 0x23c   : > { %v941_v31 = vpack.c.bf16 %v858_v28, %v855_v27 }
 0x23d   : > { %v862_v32 = vpop.f32.mrf.mxu0 }
 0x23e   : > { %v1091_v34 = vpop.f32.mrf.mxu1  ;;  %1330 = vmatmul.mubr.bf16.gmra.mxu1 %v941_v31  ;;  %v863_v40 = vadd.f32 %v2395_v63, %v862_v32 }
 0x23f   : > { %v1092_v35 = vadd.f32 %v1091_v34, %v2495_v30  ;;  %v864_v36 = vpop.f32.mrf.mxu0  ;;  %1339 = vmatprep.mubr.bf16.mxu1 %v2078_v0 }
 0x240   : > { %v1093_v37 = vpop.f32.mrf.mxu1 }
 0x241   : > { %1410 = vst [vmem:[%s2503_s24] sm:$0xff] %v1092_v35  ;;  %v1094_v38 = vadd.f32 %v1093_v37, %v2497_v33  ;;  %v865_v39 = vpop.f32.mrf.mxu0 }
 0x242   : > { %v866_v41 = vadd.f32 %v2395_v63, %v865_v39  ;;  %v1095_v42 = vpop.f32.mrf.mxu1 }
 0x243   : > { %1411 = vst [vmem:[%s2503_s24 + $0x8] sm:$0xff] %v1094_v38  ;;  %v1096_v43 = vadd.f32 %v1095_v42, %v2495_v30  ;;  %v867_v44 = vpop.f32.mrf.mxu0 }
 0x244   : > { %v942_v45 = vpack.c.bf16 %v866_v41, %v863_v40  ;;  %v1097_v46 = vpop.f32.mrf.mxu1 }
 0x245   : > { %1412 = vst [vmem:[%s2503_s24 + $0x10] sm:$0xff] %v1096_v43  ;;  %v1098_v47 = vadd.f32 %v1097_v46, %v2497_v33  ;;  %v870_v48 = vpop.f32.mrf.mxu0 }
 0x246   : > { %v1101_v49 = vpop.f32.mrf.mxu1  ;;  %1340 = vmatmul.mubr.bf16.gmra.mxu1 %v942_v45  ;;  %v871_v55 = vadd.f32 %v2395_v63, %v870_v48 }
 0x247   : > { %1413 = vst [vmem:[%s2503_s24 + $0x18] sm:$0xff] %v1098_v47  ;;  %v1102_v50 = vadd.f32 %v1101_v49, %v2495_v30  ;;  %v872_v51 = vpop.f32.mrf.mxu0  ;;  %1349 = vmatprep.mubr.bf16.mxu1 %v2078_v0 }
 0x248   : > { %v1103_v52 = vpop.f32.mrf.mxu1 }
 0x249   : > { %1414 = vst [vmem:[%s2503_s24 + $0x20] sm:$0xff] %v1102_v50  ;;  %v1104_v53 = vadd.f32 %v1103_v52, %v2497_v33  ;;  %v873_v54 = vpop.f32.mrf.mxu0 }
 0x24a   : > { %v874_v56 = vadd.f32 %v2395_v63, %v873_v54  ;;  %v1105_v57 = vpop.f32.mrf.mxu1 }
 0x24b   : > { %1415 = vst [vmem:[%s2503_s24 + $0x28] sm:$0xff] %v1104_v53  ;;  %v1106_v58 = vadd.f32 %v1105_v57, %v2495_v30  ;;  %v875_v59 = vpop.f32.mrf.mxu0 }
 0x24c   : > { %v943_v60 = vpack.c.bf16 %v874_v56, %v871_v55  ;;  %v1107_v61 = vpop.f32.mrf.mxu1 }
 0x24d   : > { %1416 = vst [vmem:[%s2503_s24 + $0x30] sm:$0xff] %v1106_v58  ;;  %v1108_v62 = vadd.f32 %v1107_v61, %v2497_v33  ;;  %v878_v1 = vpop.f32.mrf.mxu0 }
 0x24e   : > { %v1111_v2 = vpop.f32.mrf.mxu1  ;;  %1350 = vmatmul.mubr.bf16.gmra.mxu1 %v943_v60  ;;  %v879_v8 = vadd.f32 %v2395_v63, %v878_v1 }
 0x24f   : > { %1417 = vst [vmem:[%s2503_s24 + $0x38] sm:$0xff] %v1108_v62  ;;  %v1112_v3 = vadd.f32 %v1111_v2, %v2495_v30  ;;  %v880_v4 = vpop.f32.mrf.mxu0  ;;  %1359 = vmatprep.mubr.bf16.mxu1 %v2078_v0 }
 0x250   : > { %v1113_v5 = vpop.f32.mrf.mxu1 }
 0x251   : > { %1418 = vst [vmem:[%s2503_s24 + $0x40] sm:$0xff] %v1112_v3  ;;  %v1114_v6 = vadd.f32 %v1113_v5, %v2497_v33  ;;  %v881_v7 = vpop.f32.mrf.mxu0 }
 0x252   : > { %v882_v9 = vadd.f32 %v2395_v63, %v881_v7  ;;  %v1115_v10 = vpop.f32.mrf.mxu1 }
 0x253   : > { %1419 = vst [vmem:[%s2503_s24 + $0x48] sm:$0xff] %v1114_v6  ;;  %v1116_v11 = vadd.f32 %v1115_v10, %v2495_v30  ;;  %v883_v12 = vpop.f32.mrf.mxu0 }
 0x254   : > { %v944_v13 = vpack.c.bf16 %v882_v9, %v879_v8  ;;  %v1117_v14 = vpop.f32.mrf.mxu1 }
 0x255   : > { %1420 = vst [vmem:[%s2503_s24 + $0x50] sm:$0xff] %v1116_v11  ;;  %v1118_v15 = vadd.f32 %v1117_v14, %v2497_v33  ;;  %v886_v16 = vpop.f32.mrf.mxu0 }
 0x256   : > { %v1121_v17 = vpop.f32.mrf.mxu1  ;;  %1360 = vmatmul.mubr.bf16.gmra.mxu1 %v944_v13  ;;  %v887_v23 = vadd.f32 %v2395_v63, %v886_v16 }
 0x257   : > { %1421 = vst [vmem:[%s2503_s24 + $0x58] sm:$0xff] %v1118_v15  ;;  %v1122_v18 = vadd.f32 %v1121_v17, %v2495_v30  ;;  %v888_v19 = vpop.f32.mrf.mxu0  ;;  %1369 = vmatprep.mubr.bf16.mxu1 %v2078_v0 }
 0x258   : > { %v1123_v20 = vpop.f32.mrf.mxu1 }
 0x259   : > { %1422 = vst [vmem:[%s2503_s24 + $0x60] sm:$0xff] %v1122_v18  ;;  %v1124_v21 = vadd.f32 %v1123_v20, %v2497_v33  ;;  %v889_v22 = vpop.f32.mrf.mxu0 }
 0x25a   : > { %v890_v24 = vadd.f32 %v2395_v63, %v889_v22  ;;  %v1125_v25 = vpop.f32.mrf.mxu1 }
 0x25b   : > { %1423 = vst [vmem:[%s2503_s24 + $0x68] sm:$0xff] %v1124_v21  ;;  %v1126_v26 = vadd.f32 %v1125_v25, %v2495_v30  ;;  %v891_v27 = vpop.f32.mrf.mxu0 }
 0x25c   : > { %v945_v28 = vpack.c.bf16 %v890_v24, %v887_v23  ;;  %v1127_v29 = vpop.f32.mrf.mxu1 }
 0x25d   : > { %1424 = vst [vmem:[%s2503_s24 + $0x70] sm:$0xff] %v1126_v26  ;;  %v1128_v31 = vadd.f32 %v1127_v29, %v2497_v33  ;;  %v894_v32 = vpop.f32.mrf.mxu0 }
 0x25e   : > { %v1131_v34 = vpop.f32.mrf.mxu1  ;;  %1370 = vmatmul.mubr.bf16.gmra.mxu1 %v945_v28  ;;  %v895_v40 = vadd.f32 %v2395_v63, %v894_v32 }
 0x25f   : > { %1425 = vst [vmem:[%s2503_s24 + $0x78] sm:$0xff] %v1128_v31  ;;  %v1132_v35 = vadd.f32 %v1131_v34, %v2495_v30  ;;  %v896_v36 = vpop.f32.mrf.mxu0  ;;  %1379 = vmatprep.mubr.bf16.mxu1 %v2078_v0 }
 0x260   : > { %v1133_v37 = vpop.f32.mrf.mxu1 }
 0x261   : > { %1426 = vst [vmem:[%s2503_s24 + $0x80] sm:$0xff] %v1132_v35  ;;  %v1134_v38 = vadd.f32 %v1133_v37, %v2497_v33  ;;  %v897_v39 = vpop.f32.mrf.mxu0 }
 0x262   : > { %v898_v41 = vadd.f32 %v2395_v63, %v897_v39  ;;  %v1135_v42 = vpop.f32.mrf.mxu1 }
 0x263   : > { %1427 = vst [vmem:[%s2503_s24 + $0x88] sm:$0xff] %v1134_v38  ;;  %v1136_v43 = vadd.f32 %v1135_v42, %v2495_v30  ;;  %v899_v44 = vpop.f32.mrf.mxu0 }
 0x264   : > { %v946_v45 = vpack.c.bf16 %v898_v41, %v895_v40  ;;  %v1137_v46 = vpop.f32.mrf.mxu1 }
 0x265   : > { %1428 = vst [vmem:[%s2503_s24 + $0x90] sm:$0xff] %v1136_v43  ;;  %v1138_v47 = vadd.f32 %v1137_v46, %v2497_v33  ;;  %v902_v48 = vpop.f32.mrf.mxu0 }
 0x266   : > { %v1141_v49 = vpop.f32.mrf.mxu1  ;;  %1380 = vmatmul.mubr.bf16.gmra.mxu1 %v946_v45  ;;  %v903_v55 = vadd.f32 %v2395_v63, %v902_v48 }
 0x267   : > { %1429 = vst [vmem:[%s2503_s24 + $0x98] sm:$0xff] %v1138_v47  ;;  %v1142_v50 = vadd.f32 %v1141_v49, %v2495_v30  ;;  %v904_v51 = vpop.f32.mrf.mxu0  ;;  %1389 = vmatprep.mubr.bf16.mxu1 %v2078_v0 }
 0x268   : > { %v1143_v52 = vpop.f32.mrf.mxu1 }
 0x269   : > { %1430 = vst [vmem:[%s2503_s24 + $0xa0] sm:$0xff] %v1142_v50  ;;  %v1144_v53 = vadd.f32 %v1143_v52, %v2497_v33  ;;  %v905_v54 = vpop.f32.mrf.mxu0 }
 0x26a   : > { %v906_v56 = vadd.f32 %v2395_v63, %v905_v54  ;;  %v1145_v57 = vpop.f32.mrf.mxu1 }
 0x26b   : > { %1431 = vst [vmem:[%s2503_s24 + $0xa8] sm:$0xff] %v1144_v53  ;;  %v1146_v58 = vadd.f32 %v1145_v57, %v2495_v30  ;;  %v907_v59 = vpop.f32.mrf.mxu0 }
 0x26c   : > { %v947_v60 = vpack.c.bf16 %v906_v56, %v903_v55  ;;  %v1147_v61 = vpop.f32.mrf.mxu1 }
 0x26d   : > { %1432 = vst [vmem:[%s2503_s24 + $0xb0] sm:$0xff] %v1146_v58  ;;  %v1148_v62 = vadd.f32 %v1147_v61, %v2497_v33  ;;  %v910_v1 = vpop.f32.mrf.mxu0 }
 0x26e   : > { %v1151_v2 = vpop.f32.mrf.mxu1  ;;  %1390 = vmatmul.mubr.bf16.gmra.mxu1 %v947_v60  ;;  %v911_v8 = vadd.f32 %v2395_v63, %v910_v1 }
 0x26f   : > { %1433 = vst [vmem:[%s2503_s24 + $0xb8] sm:$0xff] %v1148_v62  ;;  %v1152_v3 = vadd.f32 %v1151_v2, %v2495_v30  ;;  %v912_v4 = vpop.f32.mrf.mxu0  ;;  %1399 = vmatprep.mubr.bf16.mxu1 %v2078_v0 }
 0x270   : > { %v1153_v5 = vpop.f32.mrf.mxu1 }
 0x271   : > { %1434 = vst [vmem:[%s2503_s24 + $0xc0] sm:$0xff] %v1152_v3  ;;  %v1154_v6 = vadd.f32 %v1153_v5, %v2497_v33  ;;  %v913_v7 = vpop.f32.mrf.mxu0 }
 0x272   : > { %v914_v9 = vadd.f32 %v2395_v63, %v913_v7  ;;  %v1155_v10 = vpop.f32.mrf.mxu1 }
 0x273   : > { %1435 = vst [vmem:[%s2503_s24 + $0xc8] sm:$0xff] %v1154_v6  ;;  %v1156_v11 = vadd.f32 %v1155_v10, %v2495_v30  ;;  %v915_v12 = vpop.f32.mrf.mxu0 }
 0x274   : > { %v948_v13 = vpack.c.bf16 %v914_v9, %v911_v8  ;;  %v1157_v0 = vpop.f32.mrf.mxu1 }
 0x275   : > { %1436 = vst [vmem:[%s2503_s24 + $0xd0] sm:$0xff] %v1156_v11  ;;  %v1158_v14 = vadd.f32 %v1157_v0, %v2497_v33 }
 0x276   : > { %v1161_v15 = vpop.f32.mrf.mxu1  ;;  %1400 = vmatmul.mubr.bf16.gmra.mxu1 %v948_v13 }
 0x277   : > { %1437 = vst [vmem:[%s2503_s24 + $0xd8] sm:$0xff] %v1158_v14  ;;  %v1162_v16 = vadd.f32 %v1161_v15, %v2495_v30 }
 0x278   : > { %v1163_v63 = vpop.f32.mrf.mxu1 }
 0x279   : > { %1438 = vst [vmem:[%s2503_s24 + $0xe0] sm:$0xff] %v1162_v16  ;;  %v1164_v17 = vadd.f32 %v1163_v63, %v2497_v33 }
 0x27a   : > { %v1165_v18 = vpop.f32.mrf.mxu1 }
 0x27b   : > { %1439 = vst [vmem:[%s2503_s24 + $0xe8] sm:$0xff] %v1164_v17  ;;  %v1166_v19 = vadd.f32 %v1165_v18, %v2495_v30 }
 0x27c   : > { %v1167_v20 = vpop.f32.mrf.mxu1 }
 0x27d   : > { %1440 = vst [vmem:[%s2503_s24 + $0xf0] sm:$0xff] %v1166_v19  ;;  %v1168_v21 = vadd.f32 %v1167_v20, %v2497_v33 }
 0x27e   : > { %v1171_v22 = vpop.f32.mrf.mxu1 }
 0x27f   : > { %1441 = vst [vmem:[%s2503_s24 + $0xf8] sm:$0xff] %v1168_v21  ;;  %v1172_v23 = vadd.f32 %v1171_v22, %v2495_v30 }
 0x280   : > { %v1173_v24 = vpop.f32.mrf.mxu1 }
 0x281   : > { %1442 = vst [vmem:[%s2503_s24 + $0x100] sm:$0xff] %v1172_v23  ;;  %v1174_v25 = vadd.f32 %v1173_v24, %v2497_v33 }
 0x282   : > { %v1175_v26 = vpop.f32.mrf.mxu1 }
 0x283   : > { %1443 = vst [vmem:[%s2503_s24 + $0x108] sm:$0xff] %v1174_v25  ;;  %v1176_v27 = vadd.f32 %v1175_v26, %v2495_v30 }
 0x284   : > { %v1177_v28 = vpop.f32.mrf.mxu1 }
 0x285   : > { %1444 = vst [vmem:[%s2503_s24 + $0x110] sm:$0xff] %v1176_v27  ;;  %v1178_v29 = vadd.f32 %v1177_v28, %v2497_v33 }
 0x286   : > { %v1181_v31 = vpop.f32.mrf.mxu1 }
 0x287   : > { %1445 = vst [vmem:[%s2503_s24 + $0x118] sm:$0xff] %v1178_v29  ;;  %v1182_v32 = vadd.f32 %v1181_v31, %v2495_v30 }
 0x288   : > { %v1183_v34 = vpop.f32.mrf.mxu1 }
 0x289   : > { %1446 = vst [vmem:[%s2503_s24 + $0x120] sm:$0xff] %v1182_v32  ;;  %v1184_v35 = vadd.f32 %v1183_v34, %v2497_v33 }
 0x28a   : > { %v1185_v36 = vpop.f32.mrf.mxu1 }
 0x28b   : > { %1447 = vst [vmem:[%s2503_s24 + $0x128] sm:$0xff] %v1184_v35  ;;  %v1186_v37 = vadd.f32 %v1185_v36, %v2495_v30 }
 0x28c   : > { %v1187_v38 = vpop.f32.mrf.mxu1 }
 0x28d   : > { %1448 = vst [vmem:[%s2503_s24 + $0x130] sm:$0xff] %v1186_v37  ;;  %v1188_v39 = vadd.f32 %v1187_v38, %v2497_v33 }
 0x28e   : > { %v1191_v40 = vpop.f32.mrf.mxu1 }
 0x28f   : > { %1449 = vst [vmem:[%s2503_s24 + $0x138] sm:$0xff] %v1188_v39  ;;  %v1192_v41 = vadd.f32 %v1191_v40, %v2495_v30 }
 0x290   : > { %v1193_v42 = vpop.f32.mrf.mxu1 }
 0x291   : > { %1450 = vst [vmem:[%s2503_s24 + $0x140] sm:$0xff] %v1192_v41  ;;  %v1194_v43 = vadd.f32 %v1193_v42, %v2497_v33 }
 0x292   : > { %v1195_v44 = vpop.f32.mrf.mxu1 }
 0x293   : > { %1451 = vst [vmem:[%s2503_s24 + $0x148] sm:$0xff] %v1194_v43  ;;  %v1196_v45 = vadd.f32 %v1195_v44, %v2495_v30 }
 0x294   : > { %v1197_v46 = vpop.f32.mrf.mxu1 }
 0x295   : > { %1452 = vst [vmem:[%s2503_s24 + $0x150] sm:$0xff] %v1196_v45  ;;  %v1198_v47 = vadd.f32 %v1197_v46, %v2497_v33 }
 0x296   : > { %v1201_v48 = vpop.f32.mrf.mxu1 }
 0x297   : > { %1453 = vst [vmem:[%s2503_s24 + $0x158] sm:$0xff] %v1198_v47  ;;  %v1202_v49 = vadd.f32 %v1201_v48, %v2495_v30 }
 0x298   : > { %v1203_v50 = vpop.f32.mrf.mxu1 }
 0x299   : > { %1454 = vst [vmem:[%s2503_s24 + $0x160] sm:$0xff] %v1202_v49  ;;  %v1204_v51 = vadd.f32 %v1203_v50, %v2497_v33 }
 0x29a   : > { %v1205_v52 = vpop.f32.mrf.mxu1 }
 0x29b   : > { %1455 = vst [vmem:[%s2503_s24 + $0x168] sm:$0xff] %v1204_v51  ;;  %v1206_v53 = vadd.f32 %v1205_v52, %v2495_v30 }
 0x29c   : > { %v1207_v54 = vpop.f32.mrf.mxu1 }
 0x29d   : > { %1456 = vst [vmem:[%s2503_s24 + $0x170] sm:$0xff] %v1206_v53  ;;  %v1208_v55 = vadd.f32 %v1207_v54, %v2497_v33 }
 0x29e   : > { %v1211_v56 = vpop.f32.mrf.mxu1 }
 0x29f   : > { %1457 = vst [vmem:[%s2503_s24 + $0x178] sm:$0xff] %v1208_v55  ;;  %v1212_v57 = vadd.f32 %v1211_v56, %v2495_v30 }
 0x2a0   : > { %v1213_v58 = vpop.f32.mrf.mxu1 }
 0x2a1   : > { %1458 = vst [vmem:[%s2503_s24 + $0x180] sm:$0xff] %v1212_v57  ;;  %v1214_v59 = vadd.f32 %v1213_v58, %v2497_v33 }
 0x2a2   : > { %v1215_v60 = vpop.f32.mrf.mxu1 }
 0x2a3   : > { %1459 = vst [vmem:[%s2503_s24 + $0x188] sm:$0xff] %v1214_v59  ;;  %v1216_v61 = vadd.f32 %v1215_v60, %v2495_v30 }
 0x2a4   : > { %v1217_v62 = vpop.f32.mrf.mxu1 }
 0x2a5   : > { %1460 = vst [vmem:[%s2503_s24 + $0x190] sm:$0xff] %v1216_v61  ;;  %v1218_v1 = vadd.f32 %v1217_v62, %v2497_v33 }
 0x2a6   : > { %v1221_v2 = vpop.f32.mrf.mxu1 }
 0x2a7   : > { %1461 = vst [vmem:[%s2503_s24 + $0x198] sm:$0xff] %v1218_v1  ;;  %v1222_v3 = vadd.f32 %v1221_v2, %v2495_v30 }
 0x2a8   : > { %v1223_v4 = vpop.f32.mrf.mxu1 }
 0x2a9   : > { %1462 = vst [vmem:[%s2503_s24 + $0x1a0] sm:$0xff] %v1222_v3  ;;  %v1224_v5 = vadd.f32 %v1223_v4, %v2497_v33 }
 0x2aa   : > { %v1225_v6 = vpop.f32.mrf.mxu1 }
 0x2ab   : > { %1463 = vst [vmem:[%s2503_s24 + $0x1a8] sm:$0xff] %v1224_v5  ;;  %v1226_v7 = vadd.f32 %v1225_v6, %v2495_v30 }
 0x2ac   : > { %v1227_v8 = vpop.f32.mrf.mxu1 }
 0x2ad   : > { %1464 = vst [vmem:[%s2503_s24 + $0x1b0] sm:$0xff] %v1226_v7  ;;  %v1228_v9 = vadd.f32 %v1227_v8, %v2497_v33 }
 0x2ae   : > { %v1231_v10 = vpop.f32.mrf.mxu1 }
 0x2af   : > { %1465 = vst [vmem:[%s2503_s24 + $0x1b8] sm:$0xff] %v1228_v9  ;;  %v1232_v11 = vadd.f32 %v1231_v10, %v2495_v30 }
 0x2b0   : > { %v1233_v12 = vpop.f32.mrf.mxu1 }
 0x2b1   : > { %1466 = vst [vmem:[%s2503_s24 + $0x1c0] sm:$0xff] %v1232_v11  ;;  %v1234_v13 = vadd.f32 %v1233_v12, %v2497_v33 }
 0x2b2   : > { %v1235_v0 = vpop.f32.mrf.mxu1 }
 0x2b3   : > { %1467 = vst [vmem:[%s2503_s24 + $0x1c8] sm:$0xff] %v1234_v13  ;;  %v1236_v14 = vadd.f32 %v1235_v0, %v2495_v30 }
 0x2b4   : > { %v1237_v15 = vpop.f32.mrf.mxu1 }
 0x2b5   : > { %1468 = vst [vmem:[%s2503_s24 + $0x1d0] sm:$0xff] %v1236_v14  ;;  %v1238_v16 = vadd.f32 %v1237_v15, %v2497_v33 }
 0x2b6   : > { %v1241_v63 = vpop.f32.mrf.mxu1 }
 0x2b7   : > { %1469 = vst [vmem:[%s2503_s24 + $0x1d8] sm:$0xff] %v1238_v16  ;;  %v1242_v17 = vadd.f32 %v1241_v63, %v2495_v30 }
 0x2b8   : > { %v1243_v18 = vpop.f32.mrf.mxu1 }
 0x2b9   : > { %1470 = vst [vmem:[%s2503_s24 + $0x1e0] sm:$0xff] %v1242_v17  ;;  %v1244_v19 = vadd.f32 %v1243_v18, %v2497_v33 }
 0x2ba   : > { %v1245_v20 = vpop.f32.mrf.mxu1 }
 0x2bb   : > { %1471 = vst [vmem:[%s2503_s24 + $0x1e8] sm:$0xff] %v1244_v19  ;;  %v1246_v21 = vadd.f32 %v1245_v20, %v2495_v30 }
 0x2bc   : > { %v1247_v22 = vpop.f32.mrf.mxu1 }
 0x2bd   : > { %1472 = vst [vmem:[%s2503_s24 + $0x1f0] sm:$0xff] %v1246_v21  ;;  %v1248_v23 = vadd.f32 %v1247_v22, %v2497_v33 }
 0x2be   : > { %v1251_v24 = vpop.f32.mrf.mxu1 }
 0x2bf   : > { %1473 = vst [vmem:[%s2503_s24 + $0x1f8] sm:$0xff] %v1248_v23  ;;  %v1252_v25 = vadd.f32 %v1251_v24, %v2495_v30 }
 0x2c0   : > { %v1253_v26 = vpop.f32.mrf.mxu1 }
 0x2c1   : > { %1474 = vst [vmem:[%s2503_s24 + $0x200] sm:$0xff] %v1252_v25  ;;  %v1254_v27 = vadd.f32 %v1253_v26, %v2497_v33 }
 0x2c2   : > { %v1255_v28 = vpop.f32.mrf.mxu1 }
 0x2c3   : > { %1475 = vst [vmem:[%s2503_s24 + $0x208] sm:$0xff] %v1254_v27  ;;  %v1256_v29 = vadd.f32 %v1255_v28, %v2495_v30 }
 0x2c4   : > { %v1257_v31 = vpop.f32.mrf.mxu1 }
 0x2c5   : > { %1476 = vst [vmem:[%s2503_s24 + $0x210] sm:$0xff] %v1256_v29  ;;  %v1258_v32 = vadd.f32 %v1257_v31, %v2497_v33 }
 0x2c6   : > { %v1261_v34 = vpop.f32.mrf.mxu1 }
 0x2c7   : > { %1477 = vst [vmem:[%s2503_s24 + $0x218] sm:$0xff] %v1258_v32  ;;  %v1262_v35 = vadd.f32 %v1261_v34, %v2495_v30 }
 0x2c8   : > { %v1263_v36 = vpop.f32.mrf.mxu1 }
 0x2c9   : > { %1478 = vst [vmem:[%s2503_s24 + $0x220] sm:$0xff] %v1262_v35  ;;  %v1264_v37 = vadd.f32 %v1263_v36, %v2497_v33 }
 0x2ca   : > { %v1265_v38 = vpop.f32.mrf.mxu1 }
 0x2cb   : > { %1479 = vst [vmem:[%s2503_s24 + $0x228] sm:$0xff] %v1264_v37  ;;  %v1266_v39 = vadd.f32 %v1265_v38, %v2495_v30 }
 0x2cc   : > { %v1267_v40 = vpop.f32.mrf.mxu1 }
 0x2cd   : > { %1480 = vst [vmem:[%s2503_s24 + $0x230] sm:$0xff] %v1266_v39  ;;  %v1268_v41 = vadd.f32 %v1267_v40, %v2497_v33 }
 0x2ce   : > { %v1271_v42 = vpop.f32.mrf.mxu1 }
 0x2cf   : > { %1481 = vst [vmem:[%s2503_s24 + $0x238] sm:$0xff] %v1268_v41  ;;  %v1272_v43 = vadd.f32 %v1271_v42, %v2495_v30 }
 0x2d0   : > { %v1273_v44 = vpop.f32.mrf.mxu1 }
 0x2d1   : > { %1482 = vst [vmem:[%s2503_s24 + $0x240] sm:$0xff] %v1272_v43  ;;  %v1274_v45 = vadd.f32 %v1273_v44, %v2497_v33 }
 0x2d2   : > { %v1275_v46 = vpop.f32.mrf.mxu1 }
 0x2d3   : > { %1483 = vst [vmem:[%s2503_s24 + $0x248] sm:$0xff] %v1274_v45  ;;  %v1276_v47 = vadd.f32 %v1275_v46, %v2495_v30 }
 0x2d4   : > { %v1277_v48 = vpop.f32.mrf.mxu1 }
 0x2d5   : > { %1484 = vst [vmem:[%s2503_s24 + $0x250] sm:$0xff] %v1276_v47  ;;  %v1278_v49 = vadd.f32 %v1277_v48, %v2497_v33 }
 0x2d6   : > { %v1281_v50 = vpop.f32.mrf.mxu1 }
 0x2d7   : > { %1485 = vst [vmem:[%s2503_s24 + $0x258] sm:$0xff] %v1278_v49  ;;  %v1282_v51 = vadd.f32 %v1281_v50, %v2495_v30 }
 0x2d8   : > { %v1283_v52 = vpop.f32.mrf.mxu1 }
 0x2d9   : > { %1486 = vst [vmem:[%s2503_s24 + $0x260] sm:$0xff] %v1282_v51  ;;  %v1284_v53 = vadd.f32 %v1283_v52, %v2497_v33 }
 0x2da   : > { %v1285_v54 = vpop.f32.mrf.mxu1 }
 0x2db   : > { %1487 = vst [vmem:[%s2503_s24 + $0x268] sm:$0xff] %v1284_v53  ;;  %v1286_v55 = vadd.f32 %v1285_v54, %v2495_v30 }
 0x2dc   : > { %v1287_v56 = vpop.f32.mrf.mxu1 }
 0x2dd   : > { %1488 = vst [vmem:[%s2503_s24 + $0x270] sm:$0xff] %v1286_v55  ;;  %v1288_v57 = vadd.f32 %v1287_v56, %v2497_v33 }
 0x2de   : > { %v1291_v58 = vpop.f32.mrf.mxu1 }
 0x2df   : > { %1489 = vst [vmem:[%s2503_s24 + $0x278] sm:$0xff] %v1288_v57  ;;  %v1292_v59 = vadd.f32 %v1291_v58, %v2495_v30 }
 0x2e0   : > { %v1293_v60 = vpop.f32.mrf.mxu1 }
 0x2e1   : > { %1490 = vst [vmem:[%s2503_s24 + $0x280] sm:$0xff] %v1292_v59  ;;  %v1294_v61 = vadd.f32 %v1293_v60, %v2497_v33 }
 0x2e2   : > { %v1295_v62 = vpop.f32.mrf.mxu1 }
 0x2e3   : > { %1491 = vst [vmem:[%s2503_s24 + $0x288] sm:$0xff] %v1294_v61  ;;  %v1296_v1 = vadd.f32 %v1295_v62, %v2495_v30 }
 0x2e4   : > { %v1297_v2 = vpop.f32.mrf.mxu1 }
 0x2e5   : > { %1492 = vst [vmem:[%s2503_s24 + $0x290] sm:$0xff] %v1296_v1  ;;  %v1298_v3 = vadd.f32 %v1297_v2, %v2497_v33 }
 0x2e6   : > { %v1301_v4 = vpop.f32.mrf.mxu1 }
 0x2e7   : > { %1493 = vst [vmem:[%s2503_s24 + $0x298] sm:$0xff] %v1298_v3  ;;  %v1302_v5 = vadd.f32 %v1301_v4, %v2495_v30 }
 0x2e8   : > { %v1303_v6 = vpop.f32.mrf.mxu1 }
 0x2e9   : > { %1494 = vst [vmem:[%s2503_s24 + $0x2a0] sm:$0xff] %v1302_v5  ;;  %v1304_v7 = vadd.f32 %v1303_v6, %v2497_v33 }
 0x2ea   : > { %v1305_v8 = vpop.f32.mrf.mxu1 }
 0x2eb   : > { %1495 = vst [vmem:[%s2503_s24 + $0x2a8] sm:$0xff] %v1304_v7  ;;  %v1306_v9 = vadd.f32 %v1305_v8, %v2495_v30 }
 0x2ec   : > { %v1307_v10 = vpop.f32.mrf.mxu1 }
 0x2ed   : > { %1496 = vst [vmem:[%s2503_s24 + $0x2b0] sm:$0xff] %v1306_v9  ;;  %v1308_v11 = vadd.f32 %v1307_v10, %v2497_v33 }
 0x2ee   : > { %v1311_v12 = vpop.f32.mrf.mxu1 }
 0x2ef   : > { %1497 = vst [vmem:[%s2503_s24 + $0x2b8] sm:$0xff] %v1308_v11  ;;  %v1312_v13 = vadd.f32 %v1311_v12, %v2495_v30 }
 0x2f0   : > { %v1313_v0 = vpop.f32.mrf.mxu1 }
 0x2f1   : > { %1498 = vst [vmem:[%s2503_s24 + $0x2c0] sm:$0xff] %v1312_v13  ;;  %v1314_v14 = vadd.f32 %v1313_v0, %v2497_v33 }
 0x2f2   : > { %v1315_v15 = vpop.f32.mrf.mxu1 }
 0x2f3   : > { %1499 = vst [vmem:[%s2503_s24 + $0x2c8] sm:$0xff] %v1314_v14  ;;  %v1316_v16 = vadd.f32 %v1315_v15, %v2495_v30 }
 0x2f4   : > { %v1317_v63 = vpop.f32.mrf.mxu1 }
 0x2f5   : > { %1500 = vst [vmem:[%s2503_s24 + $0x2d0] sm:$0xff] %v1316_v16  ;;  %v1318_v17 = vadd.f32 %v1317_v63, %v2497_v33 }
 0x2f6   : > { %v1321_v18 = vpop.f32.mrf.mxu1 }
 0x2f7   : > { %1501 = vst [vmem:[%s2503_s24 + $0x2d8] sm:$0xff] %v1318_v17  ;;  %v1322_v19 = vadd.f32 %v1321_v18, %v2495_v30 }
 0x2f8   : > { %v1323_v20 = vpop.f32.mrf.mxu1 }
 0x2f9   : > { %1502 = vst [vmem:[%s2503_s24 + $0x2e0] sm:$0xff] %v1322_v19  ;;  %v1324_v21 = vadd.f32 %v1323_v20, %v2497_v33 }
 0x2fa   : > { %v1325_v22 = vpop.f32.mrf.mxu1 }
 0x2fb   : > { %1503 = vst [vmem:[%s2503_s24 + $0x2e8] sm:$0xff] %v1324_v21  ;;  %v1326_v23 = vadd.f32 %v1325_v22, %v2495_v30 }
 0x2fc   : > { %v1327_v24 = vpop.f32.mrf.mxu1 }
 0x2fd   : > { %1504 = vst [vmem:[%s2503_s24 + $0x2f0] sm:$0xff] %v1326_v23  ;;  %v1328_v25 = vadd.f32 %v1327_v24, %v2497_v33 }
 0x2fe   : > { %v1331_v26 = vpop.f32.mrf.mxu1 }
 0x2ff   : > { %1505 = vst [vmem:[%s2503_s24 + $0x2f8] sm:$0xff] %v1328_v25  ;;  %v1332_v27 = vadd.f32 %v1331_v26, %v2495_v30 }
 0x300   : > { %v1333_v28 = vpop.f32.mrf.mxu1 }
 0x301   : > { %1506 = vst [vmem:[%s2503_s24 + $0x300] sm:$0xff] %v1332_v27  ;;  %v1334_v29 = vadd.f32 %v1333_v28, %v2497_v33 }
 0x302   : > { %v1335_v31 = vpop.f32.mrf.mxu1 }
 0x303   : > { %1507 = vst [vmem:[%s2503_s24 + $0x308] sm:$0xff] %v1334_v29  ;;  %v1336_v32 = vadd.f32 %v1335_v31, %v2495_v30 }
 0x304   : > { %v1337_v34 = vpop.f32.mrf.mxu1 }
 0x305   : > { %1508 = vst [vmem:[%s2503_s24 + $0x310] sm:$0xff] %v1336_v32  ;;  %v1338_v35 = vadd.f32 %v1337_v34, %v2497_v33 }
 0x306   : > { %v1341_v36 = vpop.f32.mrf.mxu1 }
 0x307   : > { %1509 = vst [vmem:[%s2503_s24 + $0x318] sm:$0xff] %v1338_v35  ;;  %v1342_v37 = vadd.f32 %v1341_v36, %v2495_v30 }
 0x308   : > { %v1343_v38 = vpop.f32.mrf.mxu1 }
 0x309   : > { %1510 = vst [vmem:[%s2503_s24 + $0x320] sm:$0xff] %v1342_v37  ;;  %v1344_v39 = vadd.f32 %v1343_v38, %v2497_v33 }
 0x30a   : > { %v1345_v40 = vpop.f32.mrf.mxu1 }
 0x30b   : > { %1511 = vst [vmem:[%s2503_s24 + $0x328] sm:$0xff] %v1344_v39  ;;  %v1346_v41 = vadd.f32 %v1345_v40, %v2495_v30 }
 0x30c   : > { %v1347_v42 = vpop.f32.mrf.mxu1 }
 0x30d   : > { %1512 = vst [vmem:[%s2503_s24 + $0x330] sm:$0xff] %v1346_v41  ;;  %v1348_v43 = vadd.f32 %v1347_v42, %v2497_v33 }
 0x30e   : > { %v1351_v44 = vpop.f32.mrf.mxu1 }
 0x30f   : > { %1513 = vst [vmem:[%s2503_s24 + $0x338] sm:$0xff] %v1348_v43  ;;  %v1352_v45 = vadd.f32 %v1351_v44, %v2495_v30 }
 0x310   : > { %v1353_v46 = vpop.f32.mrf.mxu1 }
 0x311   : > { %1514 = vst [vmem:[%s2503_s24 + $0x340] sm:$0xff] %v1352_v45  ;;  %v1354_v47 = vadd.f32 %v1353_v46, %v2497_v33 }
 0x312   : > { %v1355_v48 = vpop.f32.mrf.mxu1 }
 0x313   : > { %1515 = vst [vmem:[%s2503_s24 + $0x348] sm:$0xff] %v1354_v47  ;;  %v1356_v49 = vadd.f32 %v1355_v48, %v2495_v30 }
 0x314   : > { %v1357_v50 = vpop.f32.mrf.mxu1 }
 0x315   : > { %1516 = vst [vmem:[%s2503_s24 + $0x350] sm:$0xff] %v1356_v49  ;;  %v1358_v51 = vadd.f32 %v1357_v50, %v2497_v33 }
 0x316   : > { %v1361_v52 = vpop.f32.mrf.mxu1 }
 0x317   : > { %1517 = vst [vmem:[%s2503_s24 + $0x358] sm:$0xff] %v1358_v51  ;;  %v1362_v53 = vadd.f32 %v1361_v52, %v2495_v30 }
 0x318   : > { %v1363_v54 = vpop.f32.mrf.mxu1 }
 0x319   : > { %1518 = vst [vmem:[%s2503_s24 + $0x360] sm:$0xff] %v1362_v53  ;;  %v1364_v55 = vadd.f32 %v1363_v54, %v2497_v33 }
 0x31a   : > { %v1365_v56 = vpop.f32.mrf.mxu1 }
 0x31b   : > { %1519 = vst [vmem:[%s2503_s24 + $0x368] sm:$0xff] %v1364_v55  ;;  %v1366_v57 = vadd.f32 %v1365_v56, %v2495_v30 }
 0x31c   : > { %v1367_v58 = vpop.f32.mrf.mxu1 }
 0x31d   : > { %1520 = vst [vmem:[%s2503_s24 + $0x370] sm:$0xff] %v1366_v57  ;;  %v1368_v59 = vadd.f32 %v1367_v58, %v2497_v33 }
 0x31e   : > { %v1371_v60 = vpop.f32.mrf.mxu1 }
 0x31f   : > { %1521 = vst [vmem:[%s2503_s24 + $0x378] sm:$0xff] %v1368_v59  ;;  %v1372_v61 = vadd.f32 %v1371_v60, %v2495_v30 }
 0x320   : > { %v1373_v62 = vpop.f32.mrf.mxu1 }
 0x321   : > { %1522 = vst [vmem:[%s2503_s24 + $0x380] sm:$0xff] %v1372_v61  ;;  %v1374_v1 = vadd.f32 %v1373_v62, %v2497_v33 }
 0x322   : > { %v1375_v2 = vpop.f32.mrf.mxu1 }
 0x323   : > { %1523 = vst [vmem:[%s2503_s24 + $0x388] sm:$0xff] %v1374_v1  ;;  %v1376_v3 = vadd.f32 %v1375_v2, %v2495_v30 }
 0x324   : > { %v1377_v4 = vpop.f32.mrf.mxu1 }
 0x325   : > { %1524 = vst [vmem:[%s2503_s24 + $0x390] sm:$0xff] %v1376_v3  ;;  %v1378_v5 = vadd.f32 %v1377_v4, %v2497_v33 }
 0x326   : > { %v1381_v6 = vpop.f32.mrf.mxu1 }
 0x327   : > { %1525 = vst [vmem:[%s2503_s24 + $0x398] sm:$0xff] %v1378_v5  ;;  %v1382_v7 = vadd.f32 %v1381_v6, %v2495_v30 }
 0x328   : > { %v1383_v8 = vpop.f32.mrf.mxu1 }
 0x329   : > { %1526 = vst [vmem:[%s2503_s24 + $0x3a0] sm:$0xff] %v1382_v7  ;;  %v1384_v9 = vadd.f32 %v1383_v8, %v2497_v33 }
 0x32a   : > { %v1385_v10 = vpop.f32.mrf.mxu1 }
 0x32b   : > { %1527 = vst [vmem:[%s2503_s24 + $0x3a8] sm:$0xff] %v1384_v9  ;;  %v1386_v11 = vadd.f32 %v1385_v10, %v2495_v30 }
 0x32c   : > { %v1387_v12 = vpop.f32.mrf.mxu1 }
 0x32d   : > { %1528 = vst [vmem:[%s2503_s24 + $0x3b0] sm:$0xff] %v1386_v11  ;;  %v1388_v13 = vadd.f32 %v1387_v12, %v2497_v33 }
 0x32e   : > { %v1391_v0 = vpop.f32.mrf.mxu1 }
 0x32f   : > { %1529 = vst [vmem:[%s2503_s24 + $0x3b8] sm:$0xff] %v1388_v13  ;;  %v1392_v14 = vadd.f32 %v1391_v0, %v2495_v30 }
 0x330   : > { %v1393_v15 = vpop.f32.mrf.mxu1 }
 0x331   : > { %1530 = vst [vmem:[%s2503_s24 + $0x3c0] sm:$0xff] %v1392_v14  ;;  %v1394_v16 = vadd.f32 %v1393_v15, %v2497_v33 }
 0x332   : > { %v1395_v63 = vpop.f32.mrf.mxu1 }
 0x333   : > { %1531 = vst [vmem:[%s2503_s24 + $0x3c8] sm:$0xff] %v1394_v16  ;;  %v1396_v17 = vadd.f32 %v1395_v63, %v2495_v30 }
 0x334   : > { %v1397_v18 = vpop.f32.mrf.mxu1 }
 0x335   : > { %1532 = vst [vmem:[%s2503_s24 + $0x3d0] sm:$0xff] %v1396_v17  ;;  %v1398_v19 = vadd.f32 %v1397_v18, %v2497_v33 }
 0x336   : > { %v1401_v20 = vpop.f32.mrf.mxu1 }
 0x337   : > { %1533 = vst [vmem:[%s2503_s24 + $0x3d8] sm:$0xff] %v1398_v19  ;;  %v1402_v21 = vadd.f32 %v1401_v20, %v2495_v30 }
 0x338   : > { %v1403_v22 = vpop.f32.mrf.mxu1 }
 0x339   : > { %1534 = vst [vmem:[%s2503_s24 + $0x3e0] sm:$0xff] %v1402_v21  ;;  %v1404_v23 = vadd.f32 %v1403_v22, %v2497_v33 }
 0x33a   : > { %v1405_v24 = vpop.f32.mrf.mxu1 }
 0x33b   : > { %1535 = vst [vmem:[%s2503_s24 + $0x3e8] sm:$0xff] %v1404_v23  ;;  %v1406_v25 = vadd.f32 %v1405_v24, %v2495_v30 }
 0x33c   : > { %v1407_v26 = vpop.f32.mrf.mxu1 }
 0x33d   : > { %1536 = vst [vmem:[%s2503_s24 + $0x3f0] sm:$0xff] %v1406_v25  ;;  %v1408_v27 = vadd.f32 %v1407_v26, %v2497_v33 }
 0x33f   : > { %1537 = vst [vmem:[%s2503_s24 + $0x3f8] sm:$0xff] %v1408_v27 }
 0x340   : > { %2006 = shalt.err (!%p2003_p3)
}
 0x341   : > { %s2007_s10 = scalar_lea.hbm %s2782_s9, 16384  ;;  %s2011_s17 = scalar_lea.hbm %s2834_s5, 65536 }
 0x342   : > { %p2008_p13 = scmp.ne.s32.totalorder %s2782_s9, %s2007_s10  ;;  %p2012_p0 = scmp.lt.s32.totalorder %s2782_s9, %s2834_s5 }
 0x343   : > { %p2013_p1 = scmp.lt.s32.totalorder %s2011_s17, %s2007_s10 }
 0x344   : > { %p2009_p7 = pnand %p2008_p13, %p2852_p8 }
 0x345   : > { %p2014_p2 = por %p2013_p1, %p2012_p0 }
 0x346   : > { %p2010_p10 = pneg %p2009_p7 }
 0x348   : > { %p2015_p4 = pnand %p2014_p2, %p2010_p10 }
 0x34a   : > { %2018 = shalt.err (!%p2015_p4)
}
 0x34b   : > { %s2080_s26 = smov 256   ;;  %s2081_s6 = smov 16  }
 0x34c   : > { %1743 = dma.vmem_to_hbm [thread:$0]  (%p2852_p8), %s2784_s30, 16384, %s2782_s9, %s1539_s22, %s2080_s26, %s2080_s26, %s2081_s6  }
 0x34d PF: > { %p1775_p11 = scmp.ge.s32.totalorder %s2065_s21, 2  ;;  %s1568_s8 = sand.u32 1, %s2053_s18  }
 0x34e   : > { %p2853_p6 = scmp.ne.s32.totalorder %s2840_s25, 0  ;;  %s1569_s16 = scalar_lea.sflag [#allocation4], %s1568_s8 }
 0x350   : > { %p1763_p5 = pnand %p1775_p11, %p2853_p6 }
 0x352   : > { %p1764_p9 = pneg %p1763_p5 }
 0x354   : > { %2048 = dma.done.wait (%p1764_p9), %s1569_s16, 16384  }
 0x355   : > { %2050 = vsyncadd (%p1764_p9), %s1569_s16, 4294950912  ;;  %p20_p12 = scmp.ge.s32.totalorder %s2199_s12, 6   ;;  %s2854_s18 = smov %s2057_s19 }
 0x356   : > { %s2855_s19 = smov %s2061_s20  ;;  %s2856_s20 = smov %s2208_s14 }
 0x357   : > { %s2857_s21 = smov %s2199_s12  ;;  %22 = sbr.rel (!%p20_p12) target bundleno = 7 (0x7), region = 101 }
 0x35c   :  { %1574 = vsyncpa [#allocation3], 1 }
 0x35d   :  { %1576 = vsyncpa [#allocation3 + $0x1], 1 }
 0x35e   :  { %1577 = vsyncpa [#allocation6], 1 }
 0x35f   :  { %1578 = vsyncpa [#allocation9], 1 }
 0x360   :  { %1579 = vsyncpa [#allocation4], 1 }
 0x361   :  { %1581 = vsyncpa [#allocation4 + $0x1], 1 }

</bundles_post_ra>
